<compile_context>
chip_gen: v7x
topology: tpu7x:2x2x1
jax: 0.10.0
libtpu: 0.0.40
codegen_flags: <defaults>
</compile_context>

<pallas_src>
import functools

import numpy as np
import jax
import jax.numpy as jnp
from jax import lax
from jax.experimental import pallas as pl
from jax.experimental.pallas import tpu as pltpu

_NEG_BIG = -1e30         # finite "masked logit" value (avoids -inf arithmetic)
_MAX_BLOCK_ROWS = 32768  # double-buffered (x + out) tiles stay ~3 MiB at this cap


def _policy_value_kernel(x_ref, w1_ref, b1_ref, wh_ref, bh_ref, out_ref, *,
                         n_actions: int, in_dim: int):
    """One batch tile: VPU-FMA trunk + fused MXU head + masked softmax."""
    x = x_ref[...]                                   # (bb, D) f32

    # Trunk: K = in_dim (tiny, e.g. 4) -> unrolled VPU broadcast-FMA.
    h = x[:, 0:1] * w1_ref[0:1, :]
    for k in range(1, in_dim):                       # static unroll (compile-time D)
        h = h + x[:, k:k + 1] * w1_ref[k:k + 1, :]
    h = jnp.maximum(h + b1_ref[...], 0.0)            # (bb, H)

    # Fused heads: single matmul -> (bb, P); cols [0, A) = policy logits,
    # col A = value, remaining cols are zero padding (P is small, e.g. 8).
    y = jnp.dot(h, wh_ref[...], preferred_element_type=jnp.float32) + bh_ref[...]

    col = lax.broadcasted_iota(jnp.int32, y.shape, 1)
    is_logit = col < n_actions

    # Masked softmax over the logit columns only.  Exact normalization keeps
    # probs summing to 1 for downstream Categorical / log_prob math.
    logits = jnp.where(is_logit, y, _NEG_BIG)
    m = jnp.max(logits, axis=-1, keepdims=True)
    e = jnp.where(is_logit, jnp.exp(logits - m), 0.0)
    denom = jnp.sum(e, axis=-1, keepdims=True)
    probs = e / denom

    # Pack probs (cols < A) and the value (col == A) into one small output tile.
    out_ref[...] = (probs + jnp.where(col == n_actions, y, 0.0)).astype(out_ref.dtype)


def pack_params(params):
    """One-time fusion of policy + value heads into a single (H, P) weight.

    Hoisted out of the forward pass so the zero-pad/pack is not re-built on
    every rollout step.  Returns (w1, b1, w_heads, b_heads), all float32.
    """
    w1, b1, w2, b2, w3, b3 = params
    H, A = w2.shape
    P = max(8, ((A + 1 + 7) // 8) * 8)               # padded head width >= A + 1
    w_heads = jnp.zeros((H, P), jnp.float32)
    w_heads = w_heads.at[:, :A].set(w2.astype(jnp.float32))
    w_heads = w_heads.at[:, A:A + 1].set(w3.astype(jnp.float32))
    b_heads = jnp.zeros((1, P), jnp.float32)
    b_heads = b_heads.at[:, :A].set(b2.reshape(1, A).astype(jnp.float32))
    b_heads = b_heads.at[:, A:A + 1].set(b3.reshape(1, 1).astype(jnp.float32))
    return (w1.astype(jnp.float32),
            b1.reshape(1, H).astype(jnp.float32),
            w_heads, b_heads)


def _num_tensorcores():
    # v7x packs 2 TensorCores per chip (grid blocks shard across them via
    # dimension_semantics="parallel"); v5e/v6e expose 1 TC per device.
    try:
        kind = jax.devices()[0].device_kind.lower()
    except Exception:
        return 1
    return 2 if ("v7" in kind or "tpu7" in kind) else 1


def policy_value_forward(x, packed_params, *, n_actions, block_b=None):
    """x: (B, D) float32.  Returns (probs (B, A), value (B, 1))."""
    w1, b1, w_heads, b_heads = packed_params
    B, D = x.shape
    H = w1.shape[1]
    P = w_heads.shape[1]
    A = n_actions

    x = x.astype(jnp.float32)

    # Batch tiling: minimize grid steps.  Single block on 1-TC chips; two
    # "parallel" blocks on v7x.  Cap block rows so VMEM footprint stays small
    # on every generation (v5e's default scoped VMEM is 16 MiB).
    if block_b is None:
        block_b = pl.cdiv(B, _num_tensorcores())
    bb = int(min(max(block_b, 8), _MAX_BLOCK_ROWS))
    bb = ((bb + 7) // 8) * 8                          # sublane-aligned rows
    b_pad = pl.cdiv(B, bb) * bb
    if b_pad != B:
        x = jnp.pad(x, ((0, b_pad - B), (0, 0)))
    grid = (b_pad // bb,)

    kernel = functools.partial(_policy_value_kernel, n_actions=A, in_dim=D)

    out = pl.pallas_call(
        kernel,
        out_shape=jax.ShapeDtypeStruct((b_pad, P), jnp.float32),
        grid=grid,
        in_specs=[
            pl.BlockSpec((bb, D), lambda i: (i, 0)),   # x: tiled over batch
            pl.BlockSpec((D, H), lambda i: (0, 0)),    # weights stay VMEM-resident
            pl.BlockSpec((1, H), lambda i: (0, 0)),
            pl.BlockSpec((H, P), lambda i: (0, 0)),
            pl.BlockSpec((1, P), lambda i: (0, 0)),
        ],
        out_specs=pl.BlockSpec((bb, P), lambda i: (i, 0)),
        compiler_params=pltpu.CompilerParams(
            dimension_semantics=("parallel",)),        # shard batch blocks on v7x
    )(x, w1, b1, w_heads, b_heads)

    probs = out[:B, :A]
    value = out[:B, A:A + 1]
    return probs, value
    # TODO(synk): torch.distributions.Categorical has no Pallas equivalent; we
    # return its `probs` (sampling / log_prob stay host/JAX-side).


def init_params(key, state_dim=4, hidden=32, n_actions=2):
    k1, k2, k3 = jax.random.split(key, 3)
    # Deterministic, small-scale synthetic weights (no checkpoint).
    w1 = jax.random.normal(k1, (state_dim, hidden), jnp.float32) * 0.1
    b1 = jnp.zeros((1, hidden), jnp.float32)
    w2 = jax.random.normal(k2, (hidden, n_actions), jnp.float32) * 0.1
    b2 = jnp.zeros((1, n_actions), jnp.float32)
    w3 = jax.random.normal(k3, (hidden, 1), jnp.float32) * 0.1
    b3 = jnp.zeros((1, 1), jnp.float32)
    return (w1, b1, w2, b2, w3, b3)


if __name__ == "__main__":
    key = jax.random.PRNGKey(0)
    k_x, k_p = jax.random.split(key)

    # Small CartPole-like rollout batch (not a multiple of 8 -> exercises the
    # batch-padding path).  Tile sizing is derived automatically per chip.
    batch, state_dim, hidden, n_actions = 300, 4, 32, 2
    x = jax.random.normal(k_x, (batch, state_dim), jnp.float32)
    params = init_params(k_p, state_dim, hidden, n_actions)

    packed = pack_params(params)  # head fusion hoisted out of the forward pass
    fwd = jax.jit(policy_value_forward, static_argnames=("n_actions", "block_b"))
    probs, value = fwd(x, packed, n_actions=n_actions)
    jax.block_until_ready((probs, value))

    # Reference in float64 numpy (same math as the PyTorch forward; avoids
    # TPU default-precision matmul noise in the reference itself).
    xn = np.asarray(x, dtype=np.float64)
    w1n, b1n, w2n, b2n, w3n, b3n = (np.asarray(p, dtype=np.float64) for p in params)
    h_ref = np.maximum(xn @ w1n + b1n, 0.0)
    logits_ref = h_ref @ w2n + b2n
    logits_ref = logits_ref - logits_ref.max(axis=-1, keepdims=True)
    e_ref = np.exp(logits_ref)
    probs_ref = e_ref / e_ref.sum(axis=-1, keepdims=True)
    value_ref = h_ref @ w3n + b3n

    probs_np = np.asarray(probs)
    value_np = np.asarray(value)
    assert probs_np.shape == (batch, n_actions) and value_np.shape == (batch, 1)
    assert np.allclose(probs_np, probs_ref, atol=1e-3), "policy probs mismatch"
    assert np.allclose(probs_np.sum(axis=-1), 1.0, atol=1e-5), "probs not normalized"
    assert np.allclose(value_np, value_ref, atol=1e-3), "value mismatch"

    print("KERNEL_OK")
</pallas_src>

<mosaic_0001>
module attributes {stable_mosaic.version = 11 : i64} {
  func.func @_policy_value_kernel(%arg0: i32, %arg1: memref<304x4xf32, #tpu.memory_space<vmem>>, %arg2: memref<4x32xf32, #tpu.memory_space<vmem>>, %arg3: memref<1x32xf32, #tpu.memory_space<vmem>>, %arg4: memref<32x8xf32, #tpu.memory_space<vmem>>, %arg5: memref<1x8xf32, #tpu.memory_space<vmem>>, %arg6: memref<304x8xf32, #tpu.memory_space<vmem>>) attributes {dimension_semantics = [#tpu.dimension_semantics<parallel>], iteration_bounds = array<i64: 1>, scalar_prefetch = 0 : i64, scratch_operands = 0 : i64, tpu.core_type = #tpu.core_type<tc>, window_params = [{transform_indices = @transform_0, window_bounds = array<i64: 304, 4>}, {pipeline_mode = #tpu.pipeline_mode<synchronous>, transform_indices = @transform_1, window_bounds = array<i64: 4, 32>}, {pipeline_mode = #tpu.pipeline_mode<synchronous>, transform_indices = @transform_2, window_bounds = array<i64: 1, 32>}, {pipeline_mode = #tpu.pipeline_mode<synchronous>, transform_indices = @transform_3, window_bounds = array<i64: 32, 8>}, {pipeline_mode = #tpu.pipeline_mode<synchronous>, transform_indices = @transform_4, window_bounds = array<i64: 1, 8>}, {transform_indices = @transform_5, window_bounds = array<i64: 304, 8>}]} {
    %c0 = arith.constant 0 : index
    %c0_0 = arith.constant 0 : index
    %0 = vector.load %arg1[%c0, %c0_0] : memref<304x4xf32, #tpu.memory_space<vmem>>, vector<304x4xf32>
    %1 = vector.extract_strided_slice %0 {offsets = [0, 0], sizes = [304, 1], strides = [1, 1]} : vector<304x4xf32> to vector<304x1xf32>
    %c0_1 = arith.constant 0 : index
    %c0_2 = arith.constant 0 : index
    %2 = vector.load %arg2[%c0_1, %c0_2] : memref<4x32xf32, #tpu.memory_space<vmem>>, vector<1x32xf32>
    %3 = vector.broadcast %1 : vector<304x1xf32> to vector<304x32xf32>
    %4 = vector.broadcast %2 : vector<1x32xf32> to vector<304x32xf32>
    %5 = arith.mulf %3, %4 : vector<304x32xf32>
    %6 = vector.extract_strided_slice %0 {offsets = [0, 1], sizes = [304, 1], strides = [1, 1]} : vector<304x4xf32> to vector<304x1xf32>
    %c1 = arith.constant 1 : index
    %c0_3 = arith.constant 0 : index
    %7 = vector.load %arg2[%c1, %c0_3] : memref<4x32xf32, #tpu.memory_space<vmem>>, vector<1x32xf32>
    %8 = vector.broadcast %6 : vector<304x1xf32> to vector<304x32xf32>
    %9 = vector.broadcast %7 : vector<1x32xf32> to vector<304x32xf32>
    %10 = arith.mulf %8, %9 : vector<304x32xf32>
    %11 = arith.addf %5, %10 : vector<304x32xf32>
    %12 = vector.extract_strided_slice %0 {offsets = [0, 2], sizes = [304, 1], strides = [1, 1]} : vector<304x4xf32> to vector<304x1xf32>
    %c2 = arith.constant 2 : index
    %c0_4 = arith.constant 0 : index
    %13 = vector.load %arg2[%c2, %c0_4] : memref<4x32xf32, #tpu.memory_space<vmem>>, vector<1x32xf32>
    %14 = vector.broadcast %12 : vector<304x1xf32> to vector<304x32xf32>
    %15 = vector.broadcast %13 : vector<1x32xf32> to vector<304x32xf32>
    %16 = arith.mulf %14, %15 : vector<304x32xf32>
    %17 = arith.addf %11, %16 : vector<304x32xf32>
    %18 = vector.extract_strided_slice %0 {offsets = [0, 3], sizes = [304, 1], strides = [1, 1]} : vector<304x4xf32> to vector<304x1xf32>
    %c3 = arith.constant 3 : index
    %c0_5 = arith.constant 0 : index
    %19 = vector.load %arg2[%c3, %c0_5] : memref<4x32xf32, #tpu.memory_space<vmem>>, vector<1x32xf32>
    %20 = vector.broadcast %18 : vector<304x1xf32> to vector<304x32xf32>
    %21 = vector.broadcast %19 : vector<1x32xf32> to vector<304x32xf32>
    %22 = arith.mulf %20, %21 : vector<304x32xf32>
    %23 = arith.addf %17, %22 : vector<304x32xf32>
    %c0_6 = arith.constant 0 : index
    %c0_7 = arith.constant 0 : index
    %24 = vector.load %arg3[%c0_6, %c0_7] : memref<1x32xf32, #tpu.memory_space<vmem>>, vector<1x32xf32>
    %25 = vector.broadcast %24 : vector<1x32xf32> to vector<304x32xf32>
    %26 = arith.addf %23, %25 : vector<304x32xf32>
    %cst = arith.constant 0.000000e+00 : f32
    %27 = vector.broadcast %cst : f32 to vector<304x32xf32>
    %28 = arith.maximumf %26, %27 : vector<304x32xf32>
    %c0_8 = arith.constant 0 : index
    %c0_9 = arith.constant 0 : index
    %29 = vector.load %arg4[%c0_8, %c0_9] : memref<32x8xf32, #tpu.memory_space<vmem>>, vector<32x8xf32>
    %cst_10 = arith.constant dense<0.000000e+00> : vector<304x8xf32>
    %30 = tpu.matmul %28, %29, %cst_10 {dimension_numbers = #tpu.dot_dimension_numbers<[1], [0], [0], [1], [0, 0, 1, 1], [], []>} : vector<304x32xf32>, vector<32x8xf32>, vector<304x8xf32> -> vector<304x8xf32>
    %c0_11 = arith.constant 0 : index
    %c0_12 = arith.constant 0 : index
    %31 = vector.load %arg5[%c0_11, %c0_12] : memref<1x8xf32, #tpu.memory_space<vmem>>, vector<1x8xf32>
    %32 = vector.broadcast %31 : vector<1x8xf32> to vector<304x8xf32>
    %33 = arith.addf %30, %32 : vector<304x8xf32>
    %34 = tpu.iota {dimensions = array<i32: 1>} : vector<304x8xi32>
    %c2_i32 = arith.constant 2 : i32
    %35 = vector.broadcast %c2_i32 : i32 to vector<304x8xi32>
    %36 = arith.cmpi slt, %34, %35 : vector<304x8xi32>
    %cst_13 = arith.constant -1.000000e+30 : f32
    %37 = vector.broadcast %cst_13 : f32 to vector<304x8xf32>
    %38 = arith.select %36, %33, %37 : vector<304x8xi1>, vector<304x8xf32>
    %cst_14 = arith.constant dense<0xFF800000> : vector<304xf32>
    %39 = vector.multi_reduction <maximumf>, %38, %cst_14 [1] : vector<304x8xf32> to vector<304xf32>
    %40 = vector.shape_cast %39 : vector<304xf32> to vector<304x1xf32>
    %41 = vector.broadcast %40 : vector<304x1xf32> to vector<304x8xf32>
    %42 = arith.subf %38, %41 : vector<304x8xf32>
    %43 = math.exp %42 : vector<304x8xf32>
    %cst_15 = arith.constant 0.000000e+00 : f32
    %44 = vector.broadcast %cst_15 : f32 to vector<304x8xf32>
    %45 = arith.select %36, %43, %44 : vector<304x8xi1>, vector<304x8xf32>
    %cst_16 = arith.constant dense<0.000000e+00> : vector<304xf32>
    %46 = vector.multi_reduction <add>, %45, %cst_16 [1] : vector<304x8xf32> to vector<304xf32>
    %47 = vector.shape_cast %46 : vector<304xf32> to vector<304x1xf32>
    %48 = vector.broadcast %47 : vector<304x1xf32> to vector<304x8xf32>
    %49 = arith.divf %45, %48 : vector<304x8xf32>
    %c2_i32_17 = arith.constant 2 : i32
    %50 = vector.broadcast %c2_i32_17 : i32 to vector<304x8xi32>
    %51 = arith.cmpi eq, %34, %50 : vector<304x8xi32>
    %cst_18 = arith.constant 0.000000e+00 : f32
    %52 = vector.broadcast %cst_18 : f32 to vector<304x8xf32>
    %53 = arith.select %51, %33, %52 : vector<304x8xi1>, vector<304x8xf32>
    %54 = arith.addf %49, %53 : vector<304x8xf32>
    %c0_19 = arith.constant 0 : index
    %c0_20 = arith.constant 0 : index
    %55 = vector.load %arg6[%c0_19, %c0_20] : memref<304x8xf32, #tpu.memory_space<vmem>>, vector<304x8xf32>
    tpu.vector_store %arg6[%c0_19, %c0_20], %54 {strides = array<i32>} : memref<304x8xf32, #tpu.memory_space<vmem>>, vector<304x8xf32>,
    return
  }
  func.func @transform_0(%arg0: i32) -> (i32, i32) {
    %c0_i32 = arith.constant 0 : i32
    %c0_i32_0 = arith.constant 0 : i32
    return %arg0, %c0_i32 : i32, i32
  }
  func.func @transform_1(%arg0: i32) -> (i32, i32) {
    %c0_i32 = arith.constant 0 : i32
    %c0_i32_0 = arith.constant 0 : i32
    %c0_i32_1 = arith.constant 0 : i32
    return %c0_i32, %c0_i32_0 : i32, i32
  }
  func.func @transform_2(%arg0: i32) -> (i32, i32) {
    %c0_i32 = arith.constant 0 : i32
    %c0_i32_0 = arith.constant 0 : i32
    %c0_i32_1 = arith.constant 0 : i32
    return %c0_i32, %c0_i32_0 : i32, i32
  }
  func.func @transform_3(%arg0: i32) -> (i32, i32) {
    %c0_i32 = arith.constant 0 : i32
    %c0_i32_0 = arith.constant 0 : i32
    %c0_i32_1 = arith.constant 0 : i32
    return %c0_i32, %c0_i32_0 : i32, i32
  }
  func.func @transform_4(%arg0: i32) -> (i32, i32) {
    %c0_i32 = arith.constant 0 : i32
    %c0_i32_0 = arith.constant 0 : i32
    %c0_i32_1 = arith.constant 0 : i32
    return %c0_i32, %c0_i32_0 : i32, i32
  }
  func.func @transform_5(%arg0: i32) -> (i32, i32) {
    %c0_i32 = arith.constant 0 : i32
    %c0_i32_0 = arith.constant 0 : i32
    return %arg0, %c0_i32 : i32, i32
  }
}

</mosaic_0001>

<bundles_post_ra>
// kernel: policy_value_forward.1
= control target key start
LH: loop header
LB: loop body
LE: loop exit
PB: predicated region body
PF: predicated region fallthrough
CT: control target
= control target key end

     0   :  { %v2425_v0 = vmov 0   ;;  %v4442_v39 = vmov 1   ;;  %v4444_v46 = vmov 2   ;;  %v4446_v49 = vmov 3   ;;  %s4436_s0 = inlined_call_operand.vmem [shape: f32[304,4], index: 0, kind: input, shape index: {}]   ;;  %s4437_s3 = inlined_call_operand.vmem [shape: f32[32,8], index: 3, kind: input, shape index: {}]   ;;  %s4438_s1 = inlined_call_operand.vmem [shape: f32[4,32], index: 1, kind: input, shape index: {}]   ;;  %s4439_s2 = inlined_call_operand.vmem [shape: f32[1,32], index: 2, kind: input, shape index: {}]   ;;  %s4440_s4 = inlined_call_operand.vmem [shape: f32[1,8], index: 4, kind: input, shape index: {}]   ;;  %s4441_s5 = inlined_call_operand.vmem [shape: f32[304,8], index: 5, kind: output, shape index: {}]  }
   0x1   :  { %2239 = vset.pattern.permute.xlu1 %v2425_v0  ;;  %2238 = vset.pattern.permute.xlu0 %v2425_v0  ;;  %v2462_v1 = vld [vmem:[%s4436_s0 + $0x10] sm:$0xff]  ;;  %v2467_v2 = vld [vmem:[%s4436_s0] sm:$0xff]  ;;  %v2474_v3 = vld [vmem:[%s4436_s0 + $0x18] sm:$0xff]  ;;  %vm1084_vm0 = vcmask 261120   ;;  %vm1495_vm2 = vcmask 64512  }
   0x2   :  { %71 = vperm.xlu1 %2239, %v2462_v1   ;;  %61 = vperm.xlu0 %2238, %v2467_v2   ;;  %v2479_v4 = vld [vmem:[%s4436_s0 + $0x8] sm:$0xff]  ;;  %v2491_v6 = vld [vmem:[%s4436_s0 + $0x20] sm:$0xff]  ;;  %v2498_v7 = vld [vmem:[%s4436_s0 + $0x38] sm:$0xff] }
   0x3   :  { %v2486_v5 = vld [vmem:[%s4436_s0 + $0x28] sm:$0xff]  ;;  %v2503_v8 = vld [vmem:[%s4436_s0 + $0x30] sm:$0xff]  ;;  %v2515_v10 = vld [vmem:[%s4436_s0 + $0x40] sm:$0xff] }
   0x4   :  { %v2510_v9 = vld [vmem:[%s4436_s0 + $0x48] sm:$0xff]  ;;  %v2522_v11 = vld [vmem:[%s4436_s0 + $0x58] sm:$0xff]  ;;  %v2527_v12 = vld [vmem:[%s4436_s0 + $0x50] sm:$0xff] }
   0x5   :  { %v2534_v13 = vld [vmem:[%s4436_s0 + $0x68] sm:$0xff]  ;;  %v2539_v14 = vld [vmem:[%s4436_s0 + $0x60] sm:$0xff]  ;;  %v2546_v15 = vld [vmem:[%s4436_s0 + $0x78] sm:$0xff] }
   0x6   :  { %76 = vperm.xlu1 %2239, %v2474_v3   ;;  %66 = vperm.xlu0 %2238, %v2479_v4   ;;  %v2551_v16 = vld [vmem:[%s4436_s0 + $0x70] sm:$0xff]  ;;  %v2558_v17 = vld [vmem:[%s4436_s0 + $0x88] sm:$0xff]  ;;  %v2563_v18 = vld [vmem:[%s4436_s0 + $0x80] sm:$0xff] }
   0x7   :  { %v2570_v19 = vld [vmem:[%s4436_s0 + $0x98] sm:$0xff]  ;;  %v2575_v20 = vld [vmem:[%s4436_s0 + $0x90] sm:$0xff]  ;;  %v2582_v21 = vld [vmem:[%s4436_s0 + $0xa8] sm:$0xff] }
   0x8   :  { %4494 = vst [vmem:[#allocation2_spill] sm:$0xff] %v2570_v19  ;;  %4495 = vst [vmem:[#allocation3_spill] sm:$0xff] %v2575_v20  ;;  %v2587_v22 = vld [vmem:[%s4436_s0 + $0xa0] sm:$0xff]  ;;  %v2594_v23 = vld [vmem:[%s4436_s0 + $0xb8] sm:$0xff] }
   0x9   :  { %v2599_v24 = vld [vmem:[%s4436_s0 + $0xb0] sm:$0xff]  ;;  %v2606_v25 = vld [vmem:[%s4436_s0 + $0xc8] sm:$0xff]  ;;  %v2611_v26 = vld [vmem:[%s4436_s0 + $0xc0] sm:$0xff] }
   0xa   :  { %86 = vperm.xlu1 %2239, %v2486_v5   ;;  %81 = vperm.xlu0 %2238, %v2491_v6   ;;  %v2618_v27 = vld [vmem:[%s4436_s0 + $0xd8] sm:$0xff]  ;;  %v2623_v28 = vld [vmem:[%s4436_s0 + $0xd0] sm:$0xff]  ;;  %v2630_v29 = vld [vmem:[%s4436_s0 + $0xe8] sm:$0xff] }
   0xb   :  { %v2635_v30 = vld [vmem:[%s4436_s0 + $0xe0] sm:$0xff]  ;;  %v2642_v31 = vld [vmem:[%s4436_s0 + $0xf8] sm:$0xff]  ;;  %v2647_v32 = vld [vmem:[%s4436_s0 + $0xf0] sm:$0xff] }
   0xc   :  { %v2654_v33 = vld [vmem:[%s4436_s0 + $0x108] sm:$0xff]  ;;  %v2659_v34 = vld [vmem:[%s4436_s0 + $0x100] sm:$0xff]  ;;  %v2666_v35 = vld [vmem:[%s4436_s0 + $0x118] sm:$0xff] }
   0xd   :  { %v2671_v36 = vld [vmem:[%s4436_s0 + $0x110] sm:$0xff]  ;;  %v2678_v37 = vld [vmem:[%s4436_s0 + $0x128] sm:$0xff]  ;;  %v2683_v38 = vld [vmem:[%s4436_s0 + $0x120] sm:$0xff] }
   0xe   :  { %96 = vperm.xlu1 %2239, %v2498_v7   ;;  %91 = vperm.xlu0 %2238, %v2503_v8   ;;  %v1073_v52 = vld [vmem:[%s4437_s3] sm:$0xff]  ;;  %v1074_v53 = vld [vmem:[%s4437_s3 + $0x8] sm:$0xff]  ;;  %v1075_v57 = vld [vmem:[%s4437_s3 + $0x10] sm:$0xff] }
   0xf   :  { %v2222_v54 = vpack.c.bf16 %v1074_v53, %v1073_v52  ;;  %v1076_v58 = vld [vmem:[%s4437_s3 + $0x18] sm:$0xff] }
  0x10   :  { %v2226_v59 = vpack.c.bf16 %v1076_v58, %v1075_v57 }
  0x11   :  { %2223 = vmatprep.subr.bf16.mxu0 %v2222_v54  ;;  %2230 = vmatprep.subr.bf16.mxu1 %v2222_v54 }
  0x12   :  { %106 = vperm.xlu1 %2239, %v2510_v9   ;;  %101 = vperm.xlu0 %2238, %v2515_v10  }
  0x13   :  { %2225 = vmatpush3.bf16.msra.mxu0 %v2222_v54  ;;  %2232 = vmatpush3.bf16.msra.mxu1 %v2222_v54 }
  0x14   :  { %2227 = vmatprep.subr.bf16.mxu0 %v2226_v59  ;;  %2231 = vmatprep.subr.bf16.mxu1 %v2226_v59 }
  0x16   :  { %116 = vperm.xlu1 %2239, %v2522_v11   ;;  %111 = vperm.xlu0 %2238, %v2527_v12  }
  0x17   :  { %2229 = vmatpush3.bf16.msra.mxu0 %v2226_v59  ;;  %2233 = vmatpush3.bf16.msra.mxu1 %v2226_v59 }
  0x1a   :  { %126 = vperm.xlu1 %2239, %v2534_v13   ;;  %121 = vperm.xlu0 %2238, %v2539_v14  }
  0x1e   :  { %136 = vperm.xlu1 %2239, %v2546_v15   ;;  %131 = vperm.xlu0 %2238, %v2551_v16  }
  0x22   :  { %146 = vperm.xlu1 %2239, %v2558_v17   ;;  %141 = vperm.xlu0 %2238, %v2563_v18  }
  0x26   :  { %156 = vperm.xlu1 %2239, %v2570_v19   ;;  %151 = vperm.xlu0 %2238, %v2575_v20  }
  0x2a   :  { %166 = vperm.xlu1 %2239, %v2582_v21   ;;  %161 = vperm.xlu0 %2238, %v2587_v22  }
  0x2e   :  { %176 = vperm.xlu1 %2239, %v2594_v23   ;;  %171 = vperm.xlu0 %2238, %v2599_v24  }
  0x32   :  { %186 = vperm.xlu1 %2239, %v2606_v25   ;;  %181 = vperm.xlu0 %2238, %v2611_v26  }
  0x36   :  { %196 = vperm.xlu1 %2239, %v2618_v27   ;;  %191 = vperm.xlu0 %2238, %v2623_v28  }
  0x3a   :  { %206 = vperm.xlu1 %2239, %v2630_v29   ;;  %201 = vperm.xlu0 %2238, %v2635_v30  }
  0x3e   :  { %216 = vperm.xlu1 %2239, %v2642_v31   ;;  %211 = vperm.xlu0 %2238, %v2647_v32  }
  0x42   :  { %226 = vperm.xlu1 %2239, %v2654_v33   ;;  %221 = vperm.xlu0 %2238, %v2659_v34  }
  0x46   :  { %236 = vperm.xlu1 %2239, %v2666_v35   ;;  %231 = vperm.xlu0 %2238, %v2671_v36  }
  0x4a   :  { %246 = vperm.xlu1 %2239, %v2678_v37   ;;  %241 = vperm.xlu0 %2238, %v2683_v38  }
  0x4e   :  { %2241 = vset.pattern.permute.xlu1 %v4442_v39  ;;  %2240 = vset.pattern.permute.xlu0 %v4442_v39 }
  0x4f   :  { %297 = vperm.xlu1 %2241, %v2479_v4   ;;  %293 = vperm.xlu0 %2240, %v2467_v2  }
  0x53   :  { %301 = vperm.xlu1 %2241, %v2462_v1   ;;  %305 = vperm.xlu0 %2240, %v2474_v3  }
  0x57   :  { %309 = vperm.xlu1 %2241, %v2491_v6   ;;  %313 = vperm.xlu0 %2240, %v2486_v5  }
  0x5b   :  { %317 = vperm.xlu1 %2241, %v2503_v8   ;;  %321 = vperm.xlu0 %2240, %v2498_v7  }
  0x5f   :  { %325 = vperm.xlu1 %2241, %v2515_v10   ;;  %329 = vperm.xlu0 %2240, %v2510_v9  }
  0x63   :  { %333 = vperm.xlu1 %2241, %v2527_v12   ;;  %337 = vperm.xlu0 %2240, %v2522_v11  }
  0x67   :  { %341 = vperm.xlu1 %2241, %v2539_v14   ;;  %345 = vperm.xlu0 %2240, %v2534_v13  }
  0x6b   :  { %349 = vperm.xlu1 %2241, %v2551_v16   ;;  %353 = vperm.xlu0 %2240, %v2546_v15  }
  0x6f   :  { %357 = vperm.xlu1 %2241, %v2563_v18   ;;  %361 = vperm.xlu0 %2240, %v2558_v17  }
  0x73   :  { %365 = vperm.xlu1 %2241, %v2575_v20   ;;  %369 = vperm.xlu0 %2240, %v2570_v19  }
  0x77   :  { %373 = vperm.xlu1 %2241, %v2587_v22   ;;  %377 = vperm.xlu0 %2240, %v2582_v21  }
  0x7b   :  { %381 = vperm.xlu1 %2241, %v2599_v24   ;;  %385 = vperm.xlu0 %2240, %v2594_v23  }
  0x7f   :  { %389 = vperm.xlu1 %2241, %v2611_v26   ;;  %393 = vperm.xlu0 %2240, %v2606_v25  }
  0x81   :  { %v2715_v40 = vpop.permute.xlu1 %71  ;;  %v2717_v41 = vpop.permute.xlu0 %61 }
  0x83   :  { %397 = vperm.xlu1 %2241, %v2623_v28   ;;  %401 = vperm.xlu0 %2240, %v2618_v27  }
  0x85   :  { %v2721_v42 = vpop.permute.xlu1 %76  ;;  %v2723_v43 = vpop.permute.xlu0 %66 }
  0x87   :  { %405 = vperm.xlu1 %2241, %v2635_v30   ;;  %409 = vperm.xlu0 %2240, %v2630_v29  }
  0x89   :  { %v2727_v44 = vpop.permute.xlu1 %86  ;;  %v2729_v45 = vpop.permute.xlu0 %81 }
  0x8b   :  { %2242 = vset.pattern.permute.xlu1 %v4444_v46  ;;  %413 = vperm.xlu0 %2240, %v2647_v32  }
  0x8c   :  { %526 = vperm.xlu1 %2242, %v2467_v2  }
  0x8d   :  { %v2734_v47 = vpop.permute.xlu1 %96  ;;  %v2736_v48 = vpop.permute.xlu0 %91 }
  0x8f   :  { %417 = vperm.xlu0 %2240, %v2642_v31  }
  0x90   :  { %2243 = vset.pattern.permute.xlu1 %v4446_v49 }
  0x91   :  { %v2740_v50 = vpop.permute.xlu1 %106  ;;  %759 = vperm.xlu1 %2243, %v2467_v2   ;;  %v2743_v51 = vpop.permute.xlu0 %101 }
  0x93   :  { %2254 = vset.pattern.permute.xlu0 %v4444_v46 }
  0x94   :  { %530 = vperm.xlu0 %2254, %v2479_v4  }
  0x95   :  { %v2753_v55 = vpop.permute.xlu1 %116  ;;  %763 = vperm.xlu1 %2243, %v2479_v4   ;;  %v2756_v56 = vpop.permute.xlu0 %111 }
  0x96   :  { %4496 = vst [vmem:[#allocation4_spill] sm:$0xff] %v2753_v55  ;;  %4497 = vst [vmem:[#allocation5_spill] sm:$0xff] %v2756_v56 }
  0x98   :  { %534 = vperm.xlu0 %2254, %v2462_v1  }
  0x99   :  { %v2765_v60 = vpop.permute.xlu1 %126  ;;  %2244 = vset.pattern.permute.xlu1 %v4444_v46  ;;  %v2768_v61 = vpop.permute.xlu0 %121 }
  0x9a   :  { %4498 = vst [vmem:[#allocation6_spill] sm:$0xff] %v2765_v60  ;;  %4499 = vst [vmem:[#allocation7_spill] sm:$0xff] %v2768_v61  ;;  %606 = vperm.xlu1 %2244, %v2587_v22  }
  0x9c   :  { %538 = vperm.xlu0 %2254, %v2474_v3  }
  0x9d   :  { %v2772_v62 = vpop.permute.xlu1 %136  ;;  %v2774_v63 = vpop.permute.xlu0 %131 }
  0x9e   :  { %4500 = vst [vmem:[#allocation8_spill] sm:$0xff] %v2772_v62  ;;  %4501 = vst [vmem:[#allocation9_spill] sm:$0xff] %v2774_v63  ;;  %610 = vperm.xlu1 %2244, %v2582_v21  }
  0xa0   :  { %614 = vperm.xlu0 %2254, %v2599_v24  }
  0xa1   :  { %v2778_v0 = vpop.permute.xlu1 %146  ;;  %v2780_v2 = vpop.permute.xlu0 %141 }
  0xa2   :  { %4502 = vst [vmem:[#allocation10_spill] sm:$0xff] %v2778_v0  ;;  %4503 = vst [vmem:[#allocation11_spill] sm:$0xff] %v2780_v2  ;;  %2245 = vset.pattern.permute.xlu1 %v4446_v49 }
  0xa3   :  { %839 = vperm.xlu1 %2245, %v2587_v22  }
  0xa4   :  { %622 = vperm.xlu0 %2254, %v2611_v26  }
  0xa5   :  { %v2785_v4 = vpop.permute.xlu1 %156  ;;  %v2787_v52 = vpop.permute.xlu0 %151 }
  0xa6   :  { %4504 = vst [vmem:[#allocation12_spill] sm:$0xff] %v2785_v4  ;;  %4505 = vst [vmem:[#allocation13_spill] sm:$0xff] %v2787_v52 }
  0xa7   :  { %771 = vperm.xlu1 %2245, %v2474_v3  }
  0xa8   :  { %630 = vperm.xlu0 %2254, %v2623_v28  }
  0xa9   :  { %v2791_v53 = vpop.permute.xlu1 %166  ;;  %v2793_v54 = vpop.permute.xlu0 %161 }
  0xab   :  { %2246 = vset.pattern.permute.xlu1 %v4444_v46 }
  0xac   :  { %542 = vperm.xlu1 %2246, %v2491_v6   ;;  %638 = vperm.xlu0 %2254, %v2635_v30  }
  0xad   :  { %v2798_v22 = vpop.permute.xlu1 %176  ;;  %v2800_v57 = vpop.permute.xlu0 %171 }
  0xb0   :  { %546 = vperm.xlu1 %2246, %v2486_v5   ;;  %578 = vperm.xlu0 %2254, %v2534_v13  }
  0xb1   :  { %v2804_v3 = vpop.permute.xlu1 %186  ;;  %v2806_v58 = vpop.permute.xlu0 %181 }
  0xb4   :  { %618 = vperm.xlu1 %2246, %v2594_v23   ;;  %582 = vperm.xlu0 %2254, %v2551_v16  }
  0xb5   :  { %v2810_v59 = vpop.permute.xlu1 %196  ;;  %v2812_v39 = vpop.permute.xlu0 %191 }
  0xb6   :  { %4506 = vst [vmem:[#allocation14_spill] sm:$0xff] %v2810_v59 }
  0xb8   :  { %2247 = vset.pattern.permute.xlu1 %v4446_v49  ;;  %658 = vperm.xlu0 %2254, %v2654_v33   ;;  %v4512_v49 = vmov 2  }
  0xb9   :  { %v2816_v46 = vpop.permute.xlu1 %206  ;;  %847 = vperm.xlu1 %2247, %v2599_v24   ;;  %v2819_v4 = vpop.permute.xlu0 %201 }
  0xba   :  { %4507 = vst [vmem:[#allocation15_spill] sm:$0xff] %v2816_v46  ;;  %4508 = vst [vmem:[#allocation16_spill] sm:$0xff] %v2819_v4 }
  0xbc   :  { %590 = vperm.xlu0 %2254, %v2563_v18  }
  0xbd   :  { %v2822_v52 = vpop.permute.xlu1 %216  ;;  %779 = vperm.xlu1 %2247, %v2486_v5   ;;  %v2825_v0 = vpop.permute.xlu0 %211 }
  0xbe   :  { %4509 = vst [vmem:[#allocation17_spill] sm:$0xff] %v2822_v52  ;;  %4510 = vst [vmem:[#allocation18_spill] sm:$0xff] %v2825_v0 }
  0xc0   :  { %666 = vperm.xlu0 %2254, %v2666_v35  }
  0xc1   :  { %v2828_v62 = vpop.permute.xlu1 %226  ;;  %2248 = vset.pattern.permute.xlu1 %v4512_v49  ;;  %v2831_v2 = vpop.permute.xlu0 %221 }
  0xc2   :  { %4511 = vst [vmem:[#allocation19_spill] sm:$0xff] %v2828_v62  ;;  %4513 = vst [vmem:[#allocation20_spill] sm:$0xff] %v2831_v2  ;;  %550 = vperm.xlu1 %2248, %v2503_v8   ;;  %v4518_v62 = vmov 3  }
  0xc4   :  { %598 = vperm.xlu0 %2254, %v2575_v20  }
  0xc5   :  { %v2835_v24 = vpop.permute.xlu1 %236  ;;  %v2837_v63 = vpop.permute.xlu0 %231 }
  0xc6   :  { %4514 = vst [vmem:[#allocation21_spill] sm:$0xff] %v2835_v24  ;;  %4515 = vst [vmem:[#allocation22_spill] sm:$0xff] %v2837_v63  ;;  %554 = vperm.xlu1 %2248, %v2498_v7  }
  0xc8   :  { %674 = vperm.xlu0 %2254, %v2678_v37  }
  0xc9   :  { %v2841_v5 = vpop.permute.xlu1 %246  ;;  %v2843_v52 = vpop.permute.xlu0 %241 }
  0xca   :  { %4516 = vst [vmem:[#allocation23_spill] sm:$0xff] %v2841_v5  ;;  %4517 = vst [vmem:[#allocation24_spill] sm:$0xff] %v2843_v52  ;;  %626 = vperm.xlu1 %2248, %v2606_v25  }
  0xcc   :  { %2271 = vset.pattern.permute.xlu0 %v4518_v62 }
  0xcd   :  { %767 = vperm.xlu0 %2271, %v2462_v1  }
  0xce   :  { %v2848_v2 = vpop.permute.xlu1 %297  ;;  %2249 = vset.pattern.permute.xlu1 %v4518_v62  ;;  %v2851_v24 = vpop.permute.xlu0 %293 }
  0xcf   :  { %855 = vperm.xlu1 %2249, %v2611_v26  }
  0xd1   :  { %843 = vperm.xlu0 %2271, %v2582_v21  }
  0xd2   :  { %v2855_v63 = vpop.permute.xlu1 %301  ;;  %v2857_v5 = vpop.permute.xlu0 %305 }
  0xd3   :  { %787 = vperm.xlu1 %2249, %v2498_v7  }
  0xd5   :  { %775 = vperm.xlu0 %2271, %v2491_v6  }
  0xd6   :  { %v2861_v52 = vpop.permute.xlu1 %309  ;;  %v2863_v1 = vpop.permute.xlu0 %313 }
  0xd7   :  { %2250 = vset.pattern.permute.xlu1 %v4512_v49 }
  0xd8   :  { %558 = vperm.xlu1 %2250, %v2515_v10  }
  0xd9   :  { %851 = vperm.xlu0 %2271, %v2594_v23  }
  0xda   :  { %v2868_v26 = vpop.permute.xlu1 %317  ;;  %v2870_v21 = vpop.permute.xlu0 %321 }
  0xdc   :  { %562 = vperm.xlu1 %2250, %v2510_v9  }
  0xdd   :  { %783 = vperm.xlu0 %2271, %v2503_v8  }
  0xde   :  { %v2874_v7 = vpop.permute.xlu1 %325  ;;  %v2876_v6 = vpop.permute.xlu0 %329 }
  0xe0   :  { %634 = vperm.xlu1 %2250, %v2618_v27  }
  0xe1   :  { %859 = vperm.xlu0 %2271, %v2606_v25  }
  0xe2   :  { %v2880_v0 = vpop.permute.xlu1 %333  ;;  %v2882_v61 = vpop.permute.xlu0 %337 }
  0xe3   :  { %4519 = vst [vmem:[#allocation25_spill] sm:$0xff] %v2880_v0  ;;  %4520 = vst [vmem:[#allocation26_spill] sm:$0xff] %v2882_v61 }
  0xe4   :  { %2251 = vset.pattern.permute.xlu1 %v4518_v62 }
  0xe5   :  { %863 = vperm.xlu1 %2251, %v2623_v28   ;;  %791 = vperm.xlu0 %2271, %v2515_v10  }
  0xe6   :  { %v2887_v23 = vpop.permute.xlu1 %341  ;;  %v2889_v8 = vpop.permute.xlu0 %345 }
  0xe7   :  { %4521 = vst [vmem:[#allocation27_spill] sm:$0xff] %v2887_v23  ;;  %4522 = vst [vmem:[#allocation28_spill] sm:$0xff] %v2889_v8  ;;  %v2958_v23 = vld [vmem:[%s4438_s1 + $0x2] ss:$0 sm:$0xff] }
  0xe9   :  { %795 = vperm.xlu1 %2251, %v2510_v9   ;;  %867 = vperm.xlu0 %2271, %v2618_v27  }
  0xea   :  { %v2893_v60 = vpop.permute.xlu1 %349  ;;  %v2895_v25 = vpop.permute.xlu0 %353 }
  0xeb   :  { %4523 = vst [vmem:[#allocation29_spill] sm:$0xff] %v2893_v60  ;;  %4524 = vst [vmem:[#allocation30_spill] sm:$0xff] %v2895_v25 }
  0xed   :  { %2252 = vset.pattern.permute.xlu1 %v4512_v49  ;;  %875 = vperm.xlu0 %2271, %v2630_v29  }
  0xee   :  { %v2899_v55 = vpop.permute.xlu1 %357  ;;  %566 = vperm.xlu1 %2252, %v2527_v12   ;;  %v2902_v10 = vpop.permute.xlu0 %361 }
  0xef   :  { %4525 = vst [vmem:[#allocation31_spill] sm:$0xff] %v2899_v55  ;;  %4526 = vst [vmem:[#allocation32_spill] sm:$0xff] %v2902_v10 }
  0xf1   :  { %807 = vperm.xlu0 %2271, %v2539_v14  }
  0xf2   :  { %v2905_v28 = vpop.permute.xlu1 %365  ;;  %570 = vperm.xlu1 %2252, %v2522_v11   ;;  %v2908_v9 = vpop.permute.xlu0 %369 }
  0xf3   :  { %4527 = vst [vmem:[#allocation33_spill] sm:$0xff] %v2905_v28  ;;  %4528 = vst [vmem:[#allocation34_spill] sm:$0xff] %v2908_v9 }
  0xf5   :  { %811 = vperm.xlu0 %2271, %v2534_v13  }
  0xf6   :  { %v2911_v27 = vpop.permute.xlu1 %373  ;;  %642 = vperm.xlu1 %2252, %v2630_v29   ;;  %v2914_v25 = vpop.permute.xlu0 %377 }
  0xf9   :  { %815 = vperm.xlu0 %2271, %v2551_v16  }
  0xfa   :  { %v2917_v55 = vpop.permute.xlu1 %381  ;;  %2253 = vset.pattern.permute.xlu1 %v4518_v62  ;;  %v2920_v10 = vpop.permute.xlu0 %385 }
  0xfb   :  { %799 = vperm.xlu1 %2253, %v2527_v12  }
  0xfd   :  { %819 = vperm.xlu0 %2271, %v2546_v15  }
  0xfe   :  { %v2924_v9 = vpop.permute.xlu1 %389  ;;  %v2926_v13 = vpop.permute.xlu0 %393 }
  0xff   :  { %871 = vperm.xlu1 %2253, %v2635_v30  }
 0x101   :  { %823 = vperm.xlu0 %2271, %v2563_v18   ;;  %v2946_v18 = vld [vmem:[%s4438_s1] ss:$0 sm:$0xff] }
 0x102   :  { %v2930_v29 = vpop.permute.xlu1 %397  ;;  %v2932_v16 = vpop.permute.xlu0 %401  ;;  %v254_v46 = vmul.f32 %v2946_v18, %v2723_v43  ;;  %v4533_v43 = vmov 1  }
 0x103   :  { %803 = vperm.xlu1 %2253, %v2522_v11   ;;  %v2951_v11 = vld [vmem:[%s4438_s1 + $0x1] ss:$0 sm:$0xff] }
 0x104   :  { %v448_v60 = vmul.f32 %v2951_v11, %v2851_v24 }
 0x105   :  { %827 = vperm.xlu0 %2271, %v2558_v17  }
 0x106   :  { %v2936_v28 = vpop.permute.xlu1 %405  ;;  %v2938_v12 = vpop.permute.xlu0 %409 }
 0x107   :  { %4529 = vst [vmem:[#allocation35_spill] sm:$0xff] %v2936_v28  ;;  %4530 = vst [vmem:[#allocation36_spill] sm:$0xff] %v2938_v12  ;;  %2255 = vset.pattern.permute.xlu1 %v4512_v49 }
 0x108   :  { %574 = vperm.xlu1 %2255, %v2539_v14   ;;  %v253_v14 = vmul.f32 %v2946_v18, %v2717_v41  ;;  %v449_v41 = vmul.f32 %v2951_v11, %v2848_v2 }
 0x109   :  { %903 = vperm.xlu0 %2271, %v2683_v38  }
 0x10a   :  { %v2953_v30 = vpop.permute.xlu0 %413  ;;  %v486_v28 = vadd.f32 %v448_v60, %v253_v14  ;;  %v487_v60 = vadd.f32 %v449_v41, %v254_v46 }
 0x10b   :  { %4531 = vst [vmem:[#allocation37_spill] sm:$0xff] %v2953_v30  ;;  %v527_v8 = vpop.permute.xlu1 %526  ;;  %v2971_v30 = vld [vmem:[%s4438_s1 + $0x3] ss:$0 sm:$0xff] }
 0x10c   :  { %646 = vperm.xlu1 %2255, %v2647_v32   ;;  %v681_v61 = vmul.f32 %v2958_v23, %v527_v8 }
 0x10e   :  { %v2966_v4 = vpop.permute.xlu0 %417  ;;  %v719_v0 = vadd.f32 %v681_v61, %v486_v28 }
 0x10f   :  { %4532 = vst [vmem:[#allocation38_spill] sm:$0xff] %v2966_v4  ;;  %v2982_v4 = vld [vmem:[%s4439_s2] ss:$0 sm:$0xff] }
 0x110   :  { %650 = vperm.xlu1 %2255, %v2642_v31   ;;  %v760_v24 = vpop.permute.xlu1 %759 }
 0x111   :  { %v914_v8 = vmul.f32 %v2971_v30, %v760_v24 }
 0x113   :  { %v952_v56 = vadd.f32 %v914_v8, %v719_v0  ;;  %v531_v12 = vpop.permute.xlu0 %530  ;;  %v273_v8 = vmul.f32 %v2946_v18, %v2793_v54 }
 0x114   :  { %v682_v14 = vmul.f32 %v2958_v23, %v531_v12  ;;  %2256 = vset.pattern.permute.xlu1 %v4533_v43  ;;  %v764_v20 = vpop.permute.xlu1 %763 }
 0x115   :  { %v915_v2 = vmul.f32 %v2971_v30, %v764_v20  ;;  %421 = vperm.xlu1 %2256, %v2659_v34   ;;  %v997_v61 = vadd.f32 %v2982_v4, %v952_v56  ;;  %v468_v56 = vmul.f32 %v2951_v11, %v2911_v27 }
 0x116   :  { %v720_v28 = vadd.f32 %v682_v14, %v487_v60 }
 0x117   :  { %v2989_v24 = vpop.permute.xlu0 %534  ;;  %v1035_v19 = vmax.f32 %v997_v61, 0.0 }
 0x118   :  { %v953_v59 = vadd.f32 %v915_v2, %v720_v28 }
 0x119   :  { %2257 = vset.pattern.permute.xlu1 %v4518_v62  ;;  %v607_v46 = vpop.permute.xlu1 %606  ;;  %2165 = vmatprep.mubr.msk.f32.mxu0 %vm1084_vm0, %v1035_v19 }
 0x11a   :  { %v998_v0 = vadd.f32 %v2982_v4, %v953_v59  ;;  %879 = vperm.xlu1 %2257, %v2647_v32   ;;  %v701_v19 = vmul.f32 %v2958_v23, %v607_v46  ;;  %v506_v32 = vadd.f32 %v468_v56, %v273_v8 }
 0x11b   :  { %v539_v20 = vpop.permute.xlu0 %538 }
 0x11c   :  { %v1036_v12 = vmax.f32 %v998_v0, 0.0  ;;  %v739_v14 = vadd.f32 %v701_v19, %v506_v32 }
 0x11d   :  { %v2997_v41 = vpop.permute.xlu1 %610 }
 0x11e   :  { %2258 = vset.pattern.permute.xlu1 %v4533_v43  ;;  %2166 = vmatmul.mubr.msk.f32.vlgmr.msra.gmra.mrb[0].mxu0 %vm1084_vm0, %v1036_v12 }
 0x11f   :  { %425 = vperm.xlu1 %2258, %v2654_v33   ;;  %v615_v59 = vpop.permute.xlu0 %614 }
 0x122   :  { %v840_v60 = vpop.permute.xlu1 %839 }
 0x123   :  { %v934_v2 = vmul.f32 %v2971_v30, %v840_v60  ;;  %2259 = vset.pattern.permute.xlu1 %v4518_v62  ;;  %v3007_v27 = vpop.permute.xlu0 %622 }
 0x124   :  { %883 = vperm.xlu1 %2259, %v2642_v31  }
 0x125   :  { %v972_v61 = vadd.f32 %v934_v2, %v739_v14 }
 0x126   :  { %v772_v28 = vpop.permute.xlu1 %771 }
 0x127   :  { %v3010_v0 = vpop.permute.xlu0 %630  ;;  %v1017_v54 = vadd.f32 %v2982_v4, %v972_v61 }
 0x128   :  { %2260 = vset.pattern.permute.xlu1 %v4512_v49 }
 0x129   :  { %654 = vperm.xlu1 %2260, %v2659_v34   ;;  %v1055_v46 = vmax.f32 %v1017_v54, 0.0 }
 0x12b   :  { %v3015_v12 = vpop.permute.xlu1 %542  ;;  %2195 = vmatprep.mubr.msk.f32.mxu1 %vm1084_vm0, %v1055_v46  ;;  %v3018_v56 = vpop.permute.xlu0 %638 }
 0x12c   :  { %4534 = vst [vmem:[#allocation39_spill] sm:$0xff] %v3018_v56  ;;  %v255_v56 = vmul.f32 %v2946_v18, %v2715_v40 }
 0x12d   :  { %586 = vperm.xlu1 %2260, %v2546_v15  }
 0x12f   :  { %v547_v31 = vpop.permute.xlu1 %546  ;;  %v3021_v8 = vpop.permute.xlu0 %578 }
 0x130   :  { %4535 = vst [vmem:[#allocation40_spill] sm:$0xff] %v3021_v8  ;;  %v917_v8 = vmul.f32 %v2971_v30, %v772_v28 }
 0x131   :  { %2261 = vset.pattern.permute.xlu1 %v4533_v43 }
 0x132   :  { %429 = vperm.xlu1 %2261, %v2671_v36  }
 0x133   :  { %v3025_v19 = vpop.permute.xlu1 %618  ;;  %v3027_v32 = vpop.permute.xlu0 %582 }
 0x134   :  { %4536 = vst [vmem:[#allocation41_spill] sm:$0xff] %v3027_v32 }
 0x136   :  { %2262 = vset.pattern.permute.xlu1 %v4518_v62 }
 0x137   :  { %887 = vperm.xlu1 %2262, %v2659_v34   ;;  %v3031_v60 = vpop.permute.xlu0 %658  ;;  %v451_v34 = vmul.f32 %v2951_v11, %v2857_v5 }
 0x138   :  { %4537 = vst [vmem:[#allocation42_spill] sm:$0xff] %v3031_v60  ;;  %v848_v14 = vpop.permute.xlu1 %847 }
 0x13b   :  { %2263 = vset.pattern.permute.xlu1 %v4533_v43  ;;  %v3034_v15 = vpop.permute.xlu0 %590 }
 0x13c   :  { %4538 = vst [vmem:[#allocation43_spill] sm:$0xff] %v3034_v15  ;;  %433 = vperm.xlu1 %2263, %v2666_v35   ;;  %v780_v2 = vpop.permute.xlu1 %779  ;;  %v256_v15 = vmul.f32 %v2946_v18, %v2721_v42  ;;  %v275_v42 = vmul.f32 %v2946_v18, %v2800_v57  ;;  %v469_v57 = vmul.f32 %v2951_v11, %v2914_v25 }
 0x13e   :  { %v489_v5 = vadd.f32 %v451_v34, %v256_v15  ;;  %v257_v15 = vmul.f32 %v2946_v18, %v2729_v45 }
 0x13f   :  { %v3037_v61 = vpop.permute.xlu0 %666 }
 0x140   :  { %4539 = vst [vmem:[#allocation44_spill] sm:$0xff] %v3037_v61  ;;  %2264 = vset.pattern.permute.xlu1 %v4518_v62  ;;  %v684_v61 = vmul.f32 %v2958_v23, %v539_v20  ;;  %v683_v20 = vmul.f32 %v2958_v23, %v2989_v24  ;;  %v936_v24 = vmul.f32 %v2971_v30, %v848_v14 }
 0x141   :  { %891 = vperm.xlu1 %2264, %v2654_v33   ;;  %v3041_v54 = vpop.permute.xlu1 %550  ;;  %v450_v33 = vmul.f32 %v2951_v11, %v2855_v63  ;;  %v259_v14 = vmul.f32 %v2946_v18, %v2736_v48 }
 0x142   :  { %v722_v28 = vadd.f32 %v684_v61, %v489_v5 }
 0x143   :  { %v3043_v46 = vpop.permute.xlu0 %598  ;;  %v488_v40 = vadd.f32 %v450_v33, %v255_v56 }
 0x144   :  { %4540 = vst [vmem:[#allocation45_spill] sm:$0xff] %v3043_v46  ;;  %v470_v46 = vmul.f32 %v2951_v11, %v2917_v55  ;;  %v258_v55 = vmul.f32 %v2946_v18, %v2727_v44  ;;  %v453_v44 = vmul.f32 %v2951_v11, %v2863_v1  ;;  %v955_v45 = vadd.f32 %v917_v8, %v722_v28 }
 0x145   :  { %2265 = vset.pattern.permute.xlu1 %v4512_v49  ;;  %v3048_v60 = vpop.permute.xlu1 %554  ;;  %v703_v49 = vmul.f32 %v2958_v23, %v615_v59  ;;  %v260_v59 = vmul.f32 %v2946_v18, %v2734_v47  ;;  %v721_v5 = vadd.f32 %v683_v20, %v488_v40  ;;  %v276_v47 = vmul.f32 %v2946_v18, %v2798_v22 }
 0x146   :  { %662 = vperm.xlu1 %2265, %v2671_v36   ;;  %v508_v34 = vadd.f32 %v470_v46, %v275_v42  ;;  %v686_v1 = vmul.f32 %v2958_v23, %v547_v31  ;;  %v491_v48 = vadd.f32 %v453_v44, %v258_v55  ;;  %v472_v22 = vmul.f32 %v2951_v11, %v2924_v9 }
 0x147   :  { %v3058_v32 = vpop.permute.xlu0 %674  ;;  %v1000_v42 = vadd.f32 %v2982_v4, %v955_v45  ;;  %v685_v28 = vmul.f32 %v2958_v23, %v3015_v12  ;;  %v455_v55 = vmul.f32 %v2951_v11, %v2870_v21  ;;  %v705_v9 = vmul.f32 %v2958_v23, %v3007_v27 }
 0x148   :  { %4541 = vst [vmem:[#allocation46_spill] sm:$0xff] %v3058_v32  ;;  %v274_v32 = vmul.f32 %v2946_v18, %v2791_v53  ;;  %v741_v56 = vadd.f32 %v703_v49, %v508_v34  ;;  %v452_v53 = vmul.f32 %v2951_v11, %v2861_v52  ;;  %v919_v52 = vmul.f32 %v2971_v30, %v780_v2 }
 0x149   :  { %v3068_v63 = vpop.permute.xlu1 %626  ;;  %v471_v2 = vmul.f32 %v2951_v11, %v2920_v10 }
 0x14a   :  { %594 = vperm.xlu1 %2265, %v2558_v17   ;;  %v702_v17 = vmul.f32 %v2958_v23, %v2997_v41  ;;  %v277_v41 = vmul.f32 %v2946_v18, %v2806_v58  ;;  %v507_v49 = vadd.f32 %v469_v57, %v274_v32  ;;  %v974_v46 = vadd.f32 %v936_v24, %v741_v56 }
 0x14b   :  { %v490_v40 = vadd.f32 %v452_v53, %v257_v15  ;;  %v724_v57 = vadd.f32 %v686_v1, %v491_v48  ;;  %v493_v53 = vadd.f32 %v455_v55, %v260_v59  ;;  %v687_v48 = vmul.f32 %v2958_v23, %v3041_v54 }
 0x14c   :  { %v768_v61 = vpop.permute.xlu0 %767  ;;  %v740_v20 = vadd.f32 %v702_v17, %v507_v49  ;;  %v1019_v24 = vadd.f32 %v2982_v4, %v974_v46  ;;  %v510_v45 = vadd.f32 %v472_v22, %v277_v41  ;;  %v704_v17 = vmul.f32 %v2958_v23, %v3025_v19 }
 0x14d   :  { %v916_v25 = vmul.f32 %v2971_v30, %v768_v61  ;;  %v1038_v61 = vmax.f32 %v1000_v42, 0.0  ;;  %v957_v15 = vadd.f32 %v919_v52, %v724_v57  ;;  %v723_v27 = vadd.f32 %v685_v28, %v490_v40 }
 0x14e   :  { %2266 = vset.pattern.permute.xlu1 %v4533_v43  ;;  %v856_v8 = vpop.permute.xlu1 %855  ;;  %v743_v1 = vadd.f32 %v705_v9, %v510_v45  ;;  %v1057_v41 = vmax.f32 %v1019_v24, 0.0  ;;  %v278_v54 = vmul.f32 %v2946_v18, %v2804_v3  ;;  %v262_v3 = vmul.f32 %v2946_v18, %v2740_v50 }
 0x14f   :  { %v954_v33 = vadd.f32 %v916_v25, %v721_v5  ;;  %437 = vperm.xlu1 %2266, %v2683_v38   ;;  %v938_v5 = vmul.f32 %v2971_v30, %v856_v8  ;;  %v454_v25 = vmul.f32 %v2951_v11, %v2868_v26  ;;  %v688_v8 = vmul.f32 %v2958_v23, %v3048_v60 }
 0x150   :  { %v844_v31 = vpop.permute.xlu0 %843  ;;  %v474_v24 = vmul.f32 %v2951_v11, %v2930_v29  ;;  %v279_v50 = vmul.f32 %v2946_v18, %v2812_v39 }
 0x151   :  { %v999_v58 = vadd.f32 %v2982_v4, %v954_v33  ;;  %v935_v32 = vmul.f32 %v2971_v30, %v844_v31  ;;  %v1002_v33 = vadd.f32 %v2982_v4, %v957_v15  ;;  %v976_v22 = vadd.f32 %v938_v5, %v743_v1 }
 0x152   :  { %v788_v34 = vpop.permute.xlu1 %787  ;;  %v492_v52 = vadd.f32 %v454_v25, %v259_v14  ;;  %v726_v31 = vadd.f32 %v688_v8, %v493_v53  ;;  %v706_v14 = vmul.f32 %v2958_v23, %v3068_v63  ;;  %v456_v63 = vmul.f32 %v2951_v11, %v2874_v7 }
 0x153   :  { %v1037_v44 = vmax.f32 %v999_v58, 0.0  ;;  %v973_v12 = vadd.f32 %v935_v32, %v740_v20  ;;  %2267 = vset.pattern.permute.xlu1 %v4518_v62  ;;  %v921_v26 = vmul.f32 %v2971_v30, %v788_v34  ;;  %v1040_v32 = vmax.f32 %v1002_v33, 0.0 }
 0x154   :  { %895 = vperm.xlu1 %2267, %v2671_v36   ;;  %v776_v21 = vpop.permute.xlu0 %775  ;;  %v509_v36 = vadd.f32 %v471_v2, %v276_v47  ;;  %v725_v40 = vadd.f32 %v687_v48, %v492_v52  ;;  %v1021_v55 = vadd.f32 %v2982_v4, %v976_v22  ;;  %v512_v39 = vadd.f32 %v474_v24, %v279_v50  ;;  %v4548_v50 = vld [vmem:[#allocation25_spill] sm:$0xff] }
 0x155   :  { %v1018_v10 = vadd.f32 %v2982_v4, %v973_v12  ;;  %v918_v56 = vmul.f32 %v2971_v30, %v776_v21  ;;  %2168 = vmatprep.mubr.msk.f32.mxu0 %vm1084_vm0, %v1037_v44  ;;  %v959_v9 = vadd.f32 %v921_v26, %v726_v31 }
 0x156   :  { %2169 = vmatmul.mubr.msk.f32.gmra.mrb[2].mxu0 %vm1084_vm0, %v1038_v61  ;;  %v742_v42 = vadd.f32 %v704_v17, %v509_v36  ;;  %v1059_v15 = vmax.f32 %v1021_v55, 0.0  ;;  %v457_v17 = vmul.f32 %v2951_v11, %v2876_v6 }
 0x157   :  { %v1056_v49 = vmax.f32 %v1018_v10, 0.0  ;;  %v956_v19 = vadd.f32 %v918_v56, %v723_v27  ;;  %v559_v46 = vpop.permute.xlu1 %558  ;;  %v1004_v29 = vadd.f32 %v2982_v4, %v959_v9  ;;  %v4542_v10 = vmov 2   ;;  %v4543_v56 = vld [vmem:[#allocation14_spill] sm:$0xff] }
 0x158   :  { %2268 = vset.pattern.permute.xlu1 %v4533_v43  ;;  %v852_v59 = vpop.permute.xlu0 %851  ;;  %v473_v43 = vmul.f32 %v2951_v11, %v2926_v13  ;;  %v261_v13 = vmul.f32 %v2946_v18, %v2743_v51  ;;  %v707_v51 = vmul.f32 %v2958_v23, %v3010_v0  ;;  %v689_v21 = vmul.f32 %v2958_v23, %v559_v46 }
 0x159   :  { %v1001_v60 = vadd.f32 %v2982_v4, %v956_v19  ;;  %v937_v47 = vmul.f32 %v2971_v30, %v852_v59  ;;  %441 = vperm.xlu1 %2268, %v2678_v37   ;;  %2196 = vmatmul.mubr.msk.f32.vlgmr.msra.gmra.mrb[0].mxu1 %vm1084_vm0, %v1056_v49  ;;  %v475_v0 = vmul.f32 %v2951_v11, %v2932_v16 }
 0x15a   :  { %2198 = vmatprep.mubr.msk.f32.mxu1 %vm1084_vm0, %v1057_v41  ;;  %v511_v44 = vadd.f32 %v473_v43, %v278_v54  ;;  %v280_v25 = vmul.f32 %v2946_v18, %v4543_v56  ;;  %v494_v53 = vadd.f32 %v456_v63, %v261_v13  ;;  %v745_v36 = vadd.f32 %v707_v51, %v512_v39  ;;  %v4550_v39 = vld [vmem:[#allocation35_spill] sm:$0xff] }
 0x15b   :  { %v1039_v20 = vmax.f32 %v1001_v60, 0.0  ;;  %v975_v28 = vadd.f32 %v937_v47, %v742_v42  ;;  %v563_v58 = vpop.permute.xlu1 %562  ;;  %v1042_v41 = vmax.f32 %v1004_v29, 0.0  ;;  %v495_v26 = vadd.f32 %v457_v17, %v262_v3  ;;  %v4544_v47 = vld [vmem:[#allocation2_spill] sm:$0xff]  ;;  %v4549_v29 = vld [vmem:[#allocation15_spill] sm:$0xff] }
 0x15c   :  { %v784_v57 = vpop.permute.xlu0 %783  ;;  %v690_v6 = vmul.f32 %v2958_v23, %v563_v58  ;;  %v727_v46 = vadd.f32 %v689_v21, %v494_v53  ;;  %v513_v59 = vadd.f32 %v475_v0, %v280_v25  ;;  %v458_v51 = vmul.f32 %v2951_v11, %v4548_v50  ;;  %v4551_v25 = vld [vmem:[#allocation16_spill] sm:$0xff] }
 0x15d   :  { %v1020_v34 = vadd.f32 %v2982_v4, %v975_v28  ;;  %v920_v2 = vmul.f32 %v2971_v30, %v784_v57  ;;  %2269 = vset.pattern.permute.xlu1 %v4518_v62  ;;  %2171 = vmatprep.mubr.msk.f32.mxu0 %vm1084_vm0, %v1039_v20  ;;  %v281_v53 = vmul.f32 %v2946_v18, %v4551_v25 }
 0x15e   :  { %899 = vperm.xlu1 %2269, %v2666_v35   ;;  %2172 = vmatmul.mubr.msk.f32.gmra.mrb[4].mxu0 %vm1084_vm0, %v1040_v32  ;;  %v744_v35 = vadd.f32 %v706_v14, %v511_v44  ;;  %v728_v52 = vadd.f32 %v690_v6, %v495_v26  ;;  %v4545_v14 = vld [vmem:[#allocation3_spill] sm:$0xff]  ;;  %v4553_v6 = vld [vmem:[#allocation26_spill] sm:$0xff] }
 0x15f   :  { %v1058_v12 = vmax.f32 %v1020_v34, 0.0  ;;  %v958_v45 = vadd.f32 %v920_v2, %v725_v40  ;;  %v635_v61 = vpop.permute.xlu1 %634 }
 0x160   :  { %v860_v5 = vpop.permute.xlu0 %859  ;;  %v708_v49 = vmul.f32 %v2958_v23, %v635_v61 }
 0x161   :  { %v1003_v27 = vadd.f32 %v2982_v4, %v958_v45  ;;  %v939_v7 = vmul.f32 %v2971_v30, %v860_v5  ;;  %2199 = vmatmul.mubr.msk.f32.gmra.mrb[2].mxu1 %vm1084_vm0, %v1058_v12  ;;  %v4547_v45 = vld [vmem:[#allocation5_spill] sm:$0xff]  ;;  %v282_v5 = vmul.f32 %v2946_v18, %v4549_v29 }
 0x162   :  { %2270 = vset.pattern.permute.xlu1 %v4542_v10  ;;  %2201 = vmatprep.mubr.msk.f32.mxu1 %vm1084_vm0, %v1059_v15  ;;  %v746_v31 = vadd.f32 %v708_v49, %v513_v59  ;;  %v263_v61 = vmul.f32 %v2946_v18, %v4547_v45  ;;  %v459_v49 = vmul.f32 %v2951_v11, %v4553_v6  ;;  %v4562_v45 = vld [vmem:[#allocation41_spill] sm:$0xff] }
 0x163   :  { %v1041_v1 = vmax.f32 %v1003_v27, 0.0  ;;  %v977_v8 = vadd.f32 %v939_v7, %v744_v35  ;;  %670 = vperm.xlu1 %2270, %v2683_v38  }
 0x164   :  { %v864_v19 = vpop.permute.xlu1 %863  ;;  %v792_v16 = vpop.permute.xlu0 %791  ;;  %v496_v17 = vadd.f32 %v458_v51, %v263_v61  ;;  %v695_v61 = vmul.f32 %v2958_v23, %v4562_v45  ;;  %v4569_v45 = vld [vmem:[#allocation43_spill] sm:$0xff] }
 0x165   :  { %v1022_v33 = vadd.f32 %v2982_v4, %v977_v8  ;;  %v940_v48 = vmul.f32 %v2971_v30, %v864_v19  ;;  %v922_v22 = vmul.f32 %v2971_v30, %v792_v16  ;;  %2174 = vmatprep.mubr.msk.f32.mxu0 %vm1084_vm0, %v1041_v1  ;;  %v4552_v1 = vld [vmem:[#allocation39_spill] sm:$0xff] }
 0x166   :  { %2175 = vmatmul.mubr.msk.f32.gmra.mrb[6].mxu0 %vm1084_vm0, %v1042_v41  ;;  %v709_v8 = vmul.f32 %v2958_v23, %v4552_v1 }
 0x167   :  { %v1060_v38 = vmax.f32 %v1022_v33, 0.0  ;;  %v978_v42 = vadd.f32 %v940_v48, %v745_v36  ;;  %v960_v60 = vadd.f32 %v922_v22, %v727_v46  ;;  %602 = vperm.xlu1 %2270, %v4544_v47   ;;  %v4554_v33 = vld [vmem:[#allocation4_spill] sm:$0xff] }
 0x168   :  { %v796_v54 = vpop.permute.xlu1 %795  ;;  %v868_v43 = vpop.permute.xlu0 %867  ;;  %v264_v48 = vmul.f32 %v2946_v18, %v4554_v33 }
 0x169   :  { %v1023_v20 = vadd.f32 %v2982_v4, %v978_v42  ;;  %v1005_v28 = vadd.f32 %v2982_v4, %v960_v60  ;;  %v923_v58 = vmul.f32 %v2971_v30, %v796_v54  ;;  %v941_v32 = vmul.f32 %v2971_v30, %v868_v43  ;;  %2202 = vmatmul.mubr.msk.f32.gmra.mrb[4].mxu1 %vm1084_vm0, %v1060_v38 }
 0x16b   :  { %v1061_v40 = vmax.f32 %v1023_v20, 0.0  ;;  %v1043_v55 = vmax.f32 %v1005_v28, 0.0  ;;  %v961_v9 = vadd.f32 %v923_v58, %v728_v52  ;;  %v979_v57 = vadd.f32 %v941_v32, %v746_v31  ;;  %2272 = vset.pattern.permute.xlu1 %v4518_v62  ;;  %v4546_v62 = vld [vmem:[#allocation36_spill] sm:$0xff]  ;;  %v4556_v20 = vld [vmem:[#allocation6_spill] sm:$0xff]  ;;  %v4557_v58 = vld [vmem:[#allocation29_spill] sm:$0xff] }
 0x16c   :  { %831 = vperm.xlu1 %2272, %v4545_v14   ;;  %v876_v63 = vpop.permute.xlu0 %875  ;;  %v477_v12 = vmul.f32 %v2951_v11, %v4546_v62  ;;  %v4555_v52 = vld [vmem:[#allocation28_spill] sm:$0xff]  ;;  %v266_v28 = vmul.f32 %v2946_v18, %v4556_v20  ;;  %v462_v32 = vmul.f32 %v2951_v11, %v4557_v58  ;;  %v4561_v62 = vld [vmem:[#allocation27_spill] sm:$0xff] }
 0x16d   :  { %v1006_v34 = vadd.f32 %v2982_v4, %v961_v9  ;;  %v1024_v2 = vadd.f32 %v2982_v4, %v979_v57  ;;  %v567_v3 = vpop.permute.xlu1 %566  ;;  %2177 = vmatprep.mubr.msk.f32.mxu0 %vm1084_vm0, %v1043_v55  ;;  %2204 = vmatprep.mubr.msk.f32.mxu1 %vm1084_vm0, %v1061_v40  ;;  %v943_v0 = vmul.f32 %v2971_v30, %v876_v63  ;;  %v4558_v9 = vld [vmem:[#allocation40_spill] sm:$0xff]  ;;  %v4560_v63 = vld [vmem:[#allocation9_spill] sm:$0xff] }
 0x16e   :  { %v691_v21 = vmul.f32 %v2958_v23, %v567_v3  ;;  %v515_v7 = vadd.f32 %v477_v12, %v282_v5  ;;  %v461_v31 = vmul.f32 %v2951_v11, %v4555_v52  ;;  %v694_v57 = vmul.f32 %v2958_v23, %v4558_v9 }
 0x16f   :  { %v1044_v13 = vmax.f32 %v1006_v34, 0.0  ;;  %v1062_v24 = vmax.f32 %v1024_v2, 0.0  ;;  %v460_v12 = vmul.f32 %v2951_v11, %v4561_v62  ;;  %v4568_v62 = vld [vmem:[#allocation11_spill] sm:$0xff] }
 0x170   :  { %835 = vperm.xlu1 %2272, %v4544_v47   ;;  %v808_v27 = vpop.permute.xlu0 %807  ;;  %v729_v36 = vadd.f32 %v691_v21, %v496_v17  ;;  %v497_v47 = vadd.f32 %v459_v49, %v264_v48  ;;  %v499_v50 = vadd.f32 %v461_v31, %v266_v28  ;;  %v4563_v48 = vld [vmem:[#allocation37_spill] sm:$0xff] }
 0x171   :  { %v571_v44 = vpop.permute.xlu1 %570  ;;  %2178 = vmatmul.mubr.msk.f32.gmra.mrb[8].mxu0 %vm1084_vm0, %v1044_v13  ;;  %2205 = vmatmul.mubr.msk.f32.gmra.mrb[6].mxu1 %vm1084_vm0, %v1062_v24  ;;  %v4559_v13 = vld [vmem:[#allocation7_spill] sm:$0xff] }
 0x172   :  { %v692_v38 = vmul.f32 %v2958_v23, %v571_v44  ;;  %v265_v24 = vmul.f32 %v2946_v18, %v4559_v13  ;;  %v267_v44 = vmul.f32 %v2946_v18, %v4560_v63  ;;  %v4567_v13 = vld [vmem:[#allocation31_spill] sm:$0xff] }
 0x174   :  { %907 = vperm.xlu1 %2272, %v2678_v37   ;;  %v476_v37 = vmul.f32 %v2951_v11, %v4550_v39  ;;  %v812_v16 = vpop.permute.xlu0 %811  ;;  %v730_v14 = vadd.f32 %v692_v38, %v497_v47  ;;  %v500_v5 = vadd.f32 %v462_v32, %v267_v44  ;;  %v4566_v32 = vld [vmem:[#allocation17_spill] sm:$0xff] }
 0x175   :  { %v643_v15 = vpop.permute.xlu1 %642  ;;  %v927_v51 = vmul.f32 %v2971_v30, %v812_v16 }
 0x176   :  { %v710_v35 = vmul.f32 %v2958_v23, %v643_v15  ;;  %v514_v19 = vadd.f32 %v476_v37, %v281_v53  ;;  %v498_v37 = vadd.f32 %v460_v12, %v265_v24  ;;  %v464_v24 = vmul.f32 %v2951_v11, %v4567_v13 }
 0x177   :  { %v269_v12 = vmul.f32 %v2946_v18, %v4568_v62 }
 0x178   :  { %v748_v10 = vadd.f32 %v710_v35, %v515_v7  ;;  %v747_v59 = vadd.f32 %v709_v8, %v514_v19  ;;  %v816_v34 = vpop.permute.xlu0 %815  ;;  %v732_v7 = vadd.f32 %v694_v57, %v499_v50 }
 0x179   :  { %v928_v35 = vmul.f32 %v2971_v30, %v816_v34 }
 0x17a   :  { %v800_v56 = vpop.permute.xlu1 %799  ;;  %v981_v22 = vadd.f32 %v943_v0, %v748_v10  ;;  %v733_v0 = vadd.f32 %v695_v61, %v500_v5  ;;  %v926_v10 = vmul.f32 %v2971_v30, %v808_v27  ;;  %v965_v25 = vadd.f32 %v927_v51, %v732_v7  ;;  %v4571_v7 = vld [vmem:[#allocation8_spill] sm:$0xff] }
 0x17b   :  { %v924_v41 = vmul.f32 %v2971_v30, %v800_v56  ;;  %v697_v61 = vmul.f32 %v2958_v23, %v4569_v45  ;;  %v502_v5 = vadd.f32 %v464_v24, %v269_v12 }
 0x17c   :  { %v1026_v40 = vadd.f32 %v2982_v4, %v981_v22  ;;  %v966_v1 = vadd.f32 %v928_v35, %v733_v0  ;;  %v1010_v6 = vadd.f32 %v2982_v4, %v965_v25  ;;  %v478_v22 = vmul.f32 %v2951_v11, %v4563_v48  ;;  %v820_v57 = vpop.permute.xlu0 %819 }
 0x17d   :  { %v962_v46 = vadd.f32 %v924_v41, %v729_v36 }
 0x17e   :  { %v872_v26 = vpop.permute.xlu1 %871  ;;  %v1064_v21 = vmax.f32 %v1026_v40, 0.0  ;;  %v1011_v49 = vadd.f32 %v2982_v4, %v966_v1  ;;  %v284_v40 = vmul.f32 %v2946_v18, %v4566_v32 }
 0x17f   :  { %v1007_v42 = vadd.f32 %v2982_v4, %v962_v46  ;;  %v942_v60 = vmul.f32 %v2971_v30, %v872_v26  ;;  %v1048_v46 = vmax.f32 %v1010_v6, 0.0  ;;  %v4572_v6 = vld [vmem:[#allocation20_spill] sm:$0xff] }
 0x180   :  { %v1049_v33 = vmax.f32 %v1011_v49, 0.0  ;;  %v824_v44 = vpop.permute.xlu0 %823  ;;  %v285_v49 = vmul.f32 %v2946_v18, %v4572_v6 }
 0x181   :  { %v1045_v54 = vmax.f32 %v1007_v42, 0.0  ;;  %v980_v43 = vadd.f32 %v942_v60, %v747_v59  ;;  %v4564_v59 = vld [vmem:[#allocation18_spill] sm:$0xff]  ;;  %v930_v35 = vmul.f32 %v2971_v30, %v824_v44 }
 0x182   :  { %v804_v55 = vpop.permute.xlu1 %803  ;;  %v283_v38 = vmul.f32 %v2946_v18, %v4564_v59 }
 0x183   :  { %v1025_v2 = vadd.f32 %v2982_v4, %v980_v43  ;;  %v925_v3 = vmul.f32 %v2971_v30, %v804_v55  ;;  %2180 = vmatprep.mubr.msk.f32.mxu0 %vm1084_vm0, %v1045_v54  ;;  %v4565_v43 = vld [vmem:[#allocation38_spill] sm:$0xff] }
 0x184   :  { %v516_v60 = vadd.f32 %v478_v22, %v283_v38  ;;  %v479_v20 = vmul.f32 %v2951_v11, %v4565_v43  ;;  %v4574_v43 = vld [vmem:[#allocation42_spill] sm:$0xff]  ;;  %v828_v44 = vpop.permute.xlu0 %827 }
 0x185   :  { %v1063_v15 = vmax.f32 %v1025_v2, 0.0  ;;  %v963_v29 = vadd.f32 %v925_v3, %v730_v14  ;;  %v931_v62 = vmul.f32 %v2971_v30, %v828_v44 }
 0x186   :  { %v517_v14 = vadd.f32 %v479_v20, %v284_v40  ;;  %v714_v20 = vmul.f32 %v2958_v23, %v4574_v43 }
 0x187   :  { %v1008_v17 = vadd.f32 %v2982_v4, %v963_v29  ;;  %v575_v39 = vpop.permute.xlu1 %574  ;;  %2207 = vmatprep.mubr.msk.f32.mxu1 %vm1084_vm0, %v1063_v15  ;;  %v4570_v15 = vld [vmem:[#allocation30_spill] sm:$0xff] }
 0x188   :  { %v693_v56 = vmul.f32 %v2958_v23, %v575_v39  ;;  %2208 = vmatmul.mubr.msk.f32.gmra.mrb[8].mxu1 %vm1084_vm0, %v1064_v21  ;;  %v463_v29 = vmul.f32 %v2951_v11, %v4570_v15  ;;  %v735_v39 = vadd.f32 %v697_v61, %v502_v5 }
 0x189   :  { %v1046_v53 = vmax.f32 %v1008_v17, 0.0  ;;  %v268_v17 = vmul.f32 %v2946_v18, %v4571_v7 }
 0x18a   :  { %v731_v8 = vadd.f32 %v693_v56, %v498_v37  ;;  %v968_v25 = vadd.f32 %v930_v35, %v735_v39 }
 0x18b   :  { %v647_v36 = vpop.permute.xlu1 %646  ;;  %2181 = vmatmul.mubr.msk.f32.gmra.mrb[10].mxu0 %vm1084_vm0, %v1046_v53  ;;  %v501_v0 = vadd.f32 %v463_v29, %v268_v17 }
 0x18c   :  { %v964_v41 = vadd.f32 %v926_v10, %v731_v8  ;;  %v711_v42 = vmul.f32 %v2958_v23, %v647_v36  ;;  %v929_v10 = vmul.f32 %v2971_v30, %v820_v57  ;;  %v4575_v57 = vld [vmem:[#allocation32_spill] sm:$0xff] }
 0x18e   :  { %v1009_v19 = vadd.f32 %v2982_v4, %v964_v41  ;;  %v749_v52 = vadd.f32 %v711_v42, %v516_v60  ;;  %v1013_v41 = vadd.f32 %v2982_v4, %v968_v25  ;;  %v4573_v42 = vld [vmem:[#allocation19_spill] sm:$0xff] }
 0x18f   :  { %v651_v16 = vpop.permute.xlu1 %650  ;;  %v286_v60 = vmul.f32 %v2946_v18, %v4573_v42 }
 0x190   :  { %v1047_v27 = vmax.f32 %v1009_v19, 0.0  ;;  %v712_v55 = vmul.f32 %v2958_v23, %v651_v16 }
 0x192   :  { %2183 = vmatprep.mubr.msk.f32.mxu0 %vm1084_vm0, %v1047_v27  ;;  %v750_v2 = vadd.f32 %v712_v55, %v517_v14  ;;  %v465_v14 = vmul.f32 %v2951_v11, %v4575_v57  ;;  %v4584_v57 = vld [vmem:[#allocation34_spill] sm:$0xff] }
 0x193   :  { %2184 = vmatmul.mubr.msk.f32.gmra.mrb[12].mxu0 %vm1084_vm0, %v1048_v46 }
 0x194   :  { %v422_v26 = vpop.permute.xlu1 %421  ;;  %2186 = vmatprep.mubr.msk.f32.mxu0 %vm1084_vm0, %v1049_v33  ;;  %v1051_v33 = vmax.f32 %v1013_v41, 0.0 }
 0x195   :  { %v480_v1 = vmul.f32 %v2951_v11, %v422_v26 }
 0x197   :  { %v518_v27 = vadd.f32 %v480_v1, %v285_v49 }
 0x199   :  { %v880_v47 = vpop.permute.xlu1 %879 }
 0x19a   :  { %v944_v31 = vmul.f32 %v2971_v30, %v880_v47 }
 0x19c   :  { %v982_v54 = vadd.f32 %v944_v31, %v749_v52 }
 0x19e   :  { %v1027_v28 = vadd.f32 %v2982_v4, %v982_v54  ;;  %v426_v58 = vpop.permute.xlu1 %425 }
 0x19f   :  { %v481_v26 = vmul.f32 %v2951_v11, %v426_v58 }
 0x1a0   :  { %v1065_v9 = vmax.f32 %v1027_v28, 0.0 }
 0x1a1   :  { %v519_v31 = vadd.f32 %v481_v26, %v286_v60 }
 0x1a2   :  { %2210 = vmatprep.mubr.msk.f32.mxu1 %vm1084_vm0, %v1065_v9 }
 0x1a3   :  { %v884_v34 = vpop.permute.xlu1 %883  ;;  %v752_v32 = vadd.f32 %v714_v20, %v519_v31  ;;  %v4582_v20 = vld [vmem:[#allocation13_spill] sm:$0xff] }
 0x1a4   :  { %v945_v3 = vmul.f32 %v2971_v30, %v884_v34 }
 0x1a6   :  { %v983_v63 = vadd.f32 %v945_v3, %v750_v2  ;;  %v4576_v2 = vld [vmem:[#allocation10_spill] sm:$0xff] }
 0x1a7   :  { %v270_v3 = vmul.f32 %v2946_v18, %v4576_v2 }
 0x1a8   :  { %v1028_v50 = vadd.f32 %v2982_v4, %v983_v63  ;;  %v655_v51 = vpop.permute.xlu1 %654 }
 0x1a9   :  { %v713_v19 = vmul.f32 %v2958_v23, %v655_v51  ;;  %v503_v24 = vadd.f32 %v465_v14, %v270_v3  ;;  %v4577_v51 = vld [vmem:[#allocation22_spill] sm:$0xff]  ;;  %v467_v14 = vmul.f32 %v2951_v11, %v4584_v57 }
 0x1aa   :  { %v1066_v21 = vmax.f32 %v1028_v50, 0.0  ;;  %v287_v15 = vmul.f32 %v2946_v18, %v4577_v51 }
 0x1ab   :  { %v751_v22 = vadd.f32 %v713_v19, %v518_v27 }
 0x1ac   :  { %v587_v37 = vpop.permute.xlu1 %586  ;;  %2211 = vmatmul.mubr.msk.f32.gmra.mrb[10].mxu1 %vm1084_vm0, %v1066_v21 }
 0x1ad   :  { %v696_v56 = vmul.f32 %v2958_v23, %v587_v37 }
 0x1af   :  { %v734_v53 = vadd.f32 %v696_v56, %v501_v0 }
 0x1b1   :  { %v967_v8 = vadd.f32 %v929_v10, %v734_v53  ;;  %v430_v36 = vpop.permute.xlu1 %429  ;;  %v4578_v10 = vld [vmem:[#allocation21_spill] sm:$0xff] }
 0x1b2   :  { %v482_v45 = vmul.f32 %v2951_v11, %v430_v36  ;;  %v288_v56 = vmul.f32 %v2946_v18, %v4578_v10  ;;  %v4579_v36 = vld [vmem:[#allocation44_spill] sm:$0xff] }
 0x1b3   :  { %v1012_v16 = vadd.f32 %v2982_v4, %v967_v8  ;;  %v716_v41 = vmul.f32 %v2958_v23, %v4579_v36 }
 0x1b4   :  { %v520_v35 = vadd.f32 %v482_v45, %v287_v15  ;;  %v4586_v45 = vld [vmem:[#allocation23_spill] sm:$0xff] }
 0x1b5   :  { %v1050_v46 = vmax.f32 %v1012_v16, 0.0 }
 0x1b6   :  { %v888_v48 = vpop.permute.xlu1 %887 }
 0x1b7   :  { %v946_v59 = vmul.f32 %v2971_v30, %v888_v48  ;;  %2187 = vmatmul.mubr.msk.f32.gmra.mrb[14].mxu0 %vm1084_vm0, %v1050_v46  ;;  %v4580_v46 = vld [vmem:[#allocation24_spill] sm:$0xff]  ;;  %v904_v48 = vpop.permute.xlu0 %903 }
 0x1b8   :  { %2189 = vmatprep.mubr.msk.f32.mxu0 %vm1084_vm0, %v1051_v33  ;;  %v289_v33 = vmul.f32 %v2946_v18, %v4580_v46  ;;  %v950_v60 = vmul.f32 %v2971_v30, %v904_v48 }
 0x1b9   :  { %v984_v38 = vadd.f32 %v946_v59, %v751_v22 }
 0x1bb   :  { %v1029_v47 = vadd.f32 %v2982_v4, %v984_v38  ;;  %v434_v52 = vpop.permute.xlu1 %433 }
 0x1bc   :  { %v483_v37 = vmul.f32 %v2951_v11, %v434_v52  ;;  %v4581_v52 = vld [vmem:[#allocation33_spill] sm:$0xff] }
 0x1bd   :  { %v1067_v54 = vmax.f32 %v1029_v47, 0.0  ;;  %v466_v31 = vmul.f32 %v2951_v11, %v4581_v52 }
 0x1be   :  { %v521_v1 = vadd.f32 %v483_v37, %v288_v56 }
 0x1bf   :  { %2213 = vmatprep.mubr.msk.f32.mxu1 %vm1084_vm0, %v1067_v54 }
 0x1c0   :  { %v892_v28 = vpop.permute.xlu1 %891  ;;  %v754_v49 = vadd.f32 %v716_v41, %v521_v1 }
 0x1c1   :  { %v947_v40 = vmul.f32 %v2971_v30, %v892_v28  ;;  %v271_v28 = vmul.f32 %v2946_v18, %v4582_v20 }
 0x1c3   :  { %v985_v55 = vadd.f32 %v947_v40, %v752_v32  ;;  %v4583_v32 = vld [vmem:[#allocation45_spill] sm:$0xff] }
 0x1c4   :  { %v699_v40 = vmul.f32 %v2958_v23, %v4583_v32 }
 0x1c5   :  { %v1030_v58 = vadd.f32 %v2982_v4, %v985_v55  ;;  %v663_v9 = vpop.permute.xlu1 %662 }
 0x1c6   :  { %v715_v29 = vmul.f32 %v2958_v23, %v663_v9  ;;  %v504_v9 = vadd.f32 %v466_v31, %v271_v28 }
 0x1c7   :  { %v1068_v34 = vmax.f32 %v1030_v58, 0.0  ;;  %v1454_v58 = vlaneseq }
 0x1c8   :  { %v753_v17 = vadd.f32 %v715_v29, %v520_v35  ;;  %v3355_v29 = vld [vmem:[%s4440_s4] ss:$0 sm:$0xff] }
 0x1c9   :  { %v595_v13 = vpop.permute.xlu1 %594  ;;  %2214 = vmatmul.mubr.msk.f32.gmra.mrb[12].mxu1 %vm1084_vm0, %v1068_v34  ;;  %v4585_v34 = vld [vmem:[#allocation12_spill] sm:$0xff] }
 0x1ca   :  { %v698_v63 = vmul.f32 %v2958_v23, %v595_v13  ;;  %v272_v2 = vmul.f32 %v2946_v18, %v4585_v34 }
 0x1cc   :  { %v736_v12 = vadd.f32 %v698_v63, %v503_v24  ;;  %v737_v24 = vadd.f32 %v699_v40, %v504_v9 }
 0x1ce   :  { %v969_v61 = vadd.f32 %v931_v62, %v736_v12  ;;  %v438_v50 = vpop.permute.xlu1 %437  ;;  %v3348_v12 = vand.u32 127, %v1454_v58 }
 0x1cf   :  { %v484_v16 = vmul.f32 %v2951_v11, %v438_v50  ;;  %v505_v50 = vadd.f32 %v467_v14, %v272_v2 }
 0x1d0   :  { %v1014_v5 = vadd.f32 %v2982_v4, %v969_v61  ;;  %v290_v61 = vmul.f32 %v2946_v18, %v4586_v45  ;;  %vm1456_vm1 = vcmp.lt.s32.totalorder %v3348_v12, 2  ;;  %vm1952_vm3 = vcmp.eq.s32.totalorder %v3348_v12, 2 }
 0x1d1   :  { %v522_v26 = vadd.f32 %v484_v16, %v289_v33 }
 0x1d2   :  { %v1052_v21 = vmax.f32 %v1014_v5, 0.0 }
 0x1d3   :  { %v896_v7 = vpop.permute.xlu1 %895 }
 0x1d4   :  { %v948_v39 = vmul.f32 %v2971_v30, %v896_v7  ;;  %2190 = vmatmul.mubr.msk.f32.gmra.mrb[16].mxu0 %vm1084_vm0, %v1052_v21  ;;  %v4587_v7 = vld [vmem:[#allocation46_spill] sm:$0xff] }
 0x1d6   :  { %v986_v0 = vadd.f32 %v948_v39, %v753_v17  ;;  %v718_v17 = vmul.f32 %v2958_v23, %v4587_v7 }
 0x1d8   :  { %v1031_v25 = vadd.f32 %v2982_v4, %v986_v0  ;;  %v442_v53 = vpop.permute.xlu1 %441 }
 0x1d9   :  { %v485_v63 = vmul.f32 %v2951_v11, %v442_v53 }
 0x1da   :  { %v1069_v8 = vmax.f32 %v1031_v25, 0.0 }
 0x1db   :  { %v523_v11 = vadd.f32 %v485_v63, %v290_v61 }
 0x1dc   :  { %2216 = vmatprep.mubr.msk.f32.mxu1 %vm1084_vm0, %v1069_v8 }
 0x1dd   :  { %v900_v6 = vpop.permute.xlu1 %899  ;;  %v756_v1 = vadd.f32 %v718_v17, %v523_v11 }
 0x1de   :  { %v949_v19 = vmul.f32 %v2971_v30, %v900_v6 }
 0x1e0   :  { %v987_v27 = vadd.f32 %v949_v19, %v754_v49 }
 0x1e2   :  { %v1032_v22 = vadd.f32 %v2982_v4, %v987_v27  ;;  %v671_v59 = vpop.permute.xlu1 %670 }
 0x1e3   :  { %v717_v38 = vmul.f32 %v2958_v23, %v671_v59 }
 0x1e4   :  { %v1070_v42 = vmax.f32 %v1032_v22, 0.0 }
 0x1e5   :  { %v755_v47 = vadd.f32 %v717_v38, %v522_v26 }
 0x1e6   :  { %v603_v54 = vpop.permute.xlu1 %602  ;;  %2217 = vmatmul.mubr.msk.f32.gmra.mrb[14].mxu1 %vm1084_vm0, %v1070_v42 }
 0x1e7   :  { %v988_v43 = vadd.f32 %v950_v60, %v755_v47  ;;  %v700_v44 = vmul.f32 %v2958_v23, %v603_v54 }
 0x1e9   :  { %v1033_v55 = vadd.f32 %v2982_v4, %v988_v43  ;;  %v738_v5 = vadd.f32 %v700_v44, %v505_v50 }
 0x1eb   :  { %v1071_v3 = vmax.f32 %v1033_v55, 0.0  ;;  %v832_v13 = vpop.permute.xlu1 %831 }
 0x1ec   :  { %v932_v62 = vmul.f32 %v2971_v30, %v832_v13 }
 0x1ed   :  { %2219 = vmatprep.mubr.msk.f32.mxu1 %vm1084_vm0, %v1071_v3 }
 0x1ee   :  { %v970_v51 = vadd.f32 %v932_v62, %v737_v24 }
 0x1ef   :  { %v836_v15 = vpop.permute.xlu1 %835 }
 0x1f0   :  { %v1015_v35 = vadd.f32 %v2982_v4, %v970_v51  ;;  %v933_v21 = vmul.f32 %v2971_v30, %v836_v15 }
 0x1f1   :  { %v2167_v39 = vpop.f32.mrb[0].mxu0 }
 0x1f2   :  { %v1053_v18 = vmax.f32 %v1015_v35, 0.0  ;;  %v971_v37 = vadd.f32 %v933_v21, %v738_v5  ;;  %v3363_v0 = vadd.f32 %v2167_v39, %v3355_v29  ;;  %v1265_v10 = vpop.f32.mrb[1].mxu0 }
 0x1f3   :  { %v3366_v56 = vadd.f32 %v3355_v29, %v1265_v10  ;;  %v908_v25 = vpop.permute.xlu1 %907 }
 0x1f4   :  { %v1016_v53 = vadd.f32 %v2982_v4, %v971_v37  ;;  %v3372_v23 = vsel %vm1456_vm1, %v3363_v0, -1e+30  ;;  %v951_v8 = vmul.f32 %v2971_v30, %v908_v25  ;;  %2192 = vmatprep.mubr.msk.f32.mxu0 %vm1084_vm0, %v1053_v18 }
 0x1f5   :  { %v3379_v36 = vsel %vm1456_vm1, %v3366_v56, -1e+30  ;;  %v1499_v41 = vsel %vm1495_vm2, %v3372_v23, -inf }
 0x1f6   :  { %v1054_v6 = vmax.f32 %v1016_v53, 0.0  ;;  %v989_v49 = vadd.f32 %v951_v8, %v756_v1  ;;  %1500 = vmax.xlane.f32.xlu1 %v1499_v41  ;;  %v1496_v19 = vsel %vm1495_vm2, %v3379_v36, -inf }
 0x1f7   :  { %1497 = vmax.xlane.f32.xlu0 %v1496_v19 }
 0x1f8   :  { %v1034_v16 = vadd.f32 %v2982_v4, %v989_v49  ;;  %2193 = vmatmul.mubr.msk.f32.gmra.mrb[18].mxu0 %vm1084_vm0, %v1054_v6 }
 0x1fa   :  { %v1072_v30 = vmax.f32 %v1034_v16, 0.0 }
 0x1fc   :  { %2220 = vmatmul.mubr.msk.f32.gmra.mrb[16].mxu1 %vm1084_vm0, %v1072_v30 }
 0x229   :  { %v2170_v27 = vpop.f32.mrb[2].mxu0 }
 0x22a   :  { %v1275_v46 = vpop.f32.mrb[3].mxu0  ;;  %v3389_v33 = vadd.f32 %v2170_v27, %v3355_v29 }
 0x22b   :  { %v3392_v48 = vadd.f32 %v3355_v29, %v1275_v46 }
 0x22c   :  { %4588 = vst [vmem:[#allocation14_spill] sm:$0xff] %v3389_v33  ;;  %v3394_v22 = vpop.f32.mrb[0].mxu1  ;;  %v3408_v38 = vsel %vm1456_vm1, %v3389_v33, -1e+30 }
 0x22d   :  { %4589 = vst [vmem:[#allocation2_spill] sm:$0xff] %v3392_v48  ;;  %v3399_v59 = vsel %vm1456_vm1, %v3392_v48, -1e+30  ;;  %v3401_v4 = vpop.f32.mrb[1].mxu1  ;;  %v1505_v52 = vsel %vm1495_vm2, %v3408_v38, -inf }
 0x22e   :  { %v1502_v26 = vsel %vm1495_vm2, %v3399_v59, -inf }
 0x22f   :  { %1503 = vmax.xlane.f32.xlu0 %v1502_v26 }
 0x231   :  { %v2173_v42 = vpop.f32.mrb[4].mxu0 }
 0x232   :  { %v3411_v60 = vadd.f32 %v2173_v42, %v3355_v29  ;;  %v1285_v47 = vpop.f32.mrb[5].mxu0 }
 0x233   :  { %v3416_v31 = vadd.f32 %v3355_v29, %v1285_v47  ;;  %1506 = vmax.xlane.f32.xlu0 %v1505_v52 }
 0x234   :  { %4590 = vst [vmem:[#allocation3_spill] sm:$0xff] %v3411_v60  ;;  %v3421_v54 = vsel %vm1456_vm1, %v3411_v60, -1e+30  ;;  %v3423_v43 = vpop.f32.mrb[2].mxu1 }
 0x235   :  { %4591 = vst [vmem:[#allocation36_spill] sm:$0xff] %v3416_v31  ;;  %v3428_v20 = vsel %vm1456_vm1, %v3416_v31, -1e+30  ;;  %v3430_v28 = vpop.f32.mrb[3].mxu1  ;;  %v1511_v32 = vsel %vm1495_vm2, %v3421_v54, -inf }
 0x236   :  { %v1508_v40 = vsel %vm1495_vm2, %v3428_v20, -inf }
 0x237   :  { %1512 = vmax.xlane.f32.xlu0 %v1511_v32  ;;  %1509 = vmax.xlane.f32.xlu1 %v1508_v40 }
 0x239   :  { %v2176_v55 = vpop.f32.mrb[6].mxu0 }
 0x23a   :  { %v3437_v58 = vadd.f32 %v2176_v55, %v3355_v29  ;;  %v1295_v9 = vpop.f32.mrb[7].mxu0 }
 0x23b   :  { %v3440_v57 = vadd.f32 %v3355_v29, %v1295_v9 }
 0x23c   :  { %4592 = vst [vmem:[#allocation5_spill] sm:$0xff] %v3437_v58  ;;  %v3445_v14 = vsel %vm1456_vm1, %v3437_v58, -1e+30  ;;  %v3447_v34 = vpop.f32.mrb[4].mxu1 }
 0x23d   :  { %4593 = vst [vmem:[#allocation25_spill] sm:$0xff] %v3440_v57  ;;  %v3452_v2 = vsel %vm1456_vm1, %v3440_v57, -1e+30  ;;  %v3454_v3 = vpop.f32.mrb[5].mxu1  ;;  %v1517_v13 = vsel %vm1495_vm2, %v3445_v14, -inf }
 0x23e   :  { %1518 = vmax.xlane.f32.xlu0 %v1517_v13  ;;  %v1514_v24 = vsel %vm1495_vm2, %v3452_v2, -inf }
 0x23f   :  { %1515 = vmax.xlane.f32.xlu1 %v1514_v24 }
 0x244   :  { %v2179_v63 = vpop.f32.mrb[8].mxu0  ;;  %v3460_v44 = vpop.f32.mrb[6].mxu1 }
 0x245   :  { %v3463_v62 = vadd.f32 %v2179_v63, %v3355_v29  ;;  %v1305_v45 = vpop.f32.mrb[9].mxu0  ;;  %v3465_v61 = vpop.f32.mrb[7].mxu1 }
 0x246   :  { %v3468_v50 = vadd.f32 %v3355_v29, %v1305_v45 }
 0x247   :  { %4594 = vst [vmem:[#allocation15_spill] sm:$0xff] %v3463_v62  ;;  %v3473_v51 = vsel %vm1456_vm1, %v3463_v62, -1e+30 }
 0x248   :  { %4595 = vst [vmem:[#allocation35_spill] sm:$0xff] %v3468_v50  ;;  %v3478_v15 = vsel %vm1456_vm1, %v3468_v50, -1e+30  ;;  %v1523_v11 = vsel %vm1495_vm2, %v3473_v51, -inf }
 0x249   :  { %v1520_v5 = vsel %vm1495_vm2, %v3478_v15, -inf  ;;  %1524 = vmax.xlane.f32.xlu0 %v1523_v11 }
 0x24a   :  { %1521 = vmax.xlane.f32.xlu1 %v1520_v5 }
 0x25b   :  { %v3484_v35 = vpop.f32.mrb[8].mxu1 }
 0x25c   :  { %v3486_v21 = vpop.f32.mrb[9].mxu1 }
 0x25e   :  { %v2182_v7 = vpop.f32.mrb[10].mxu0 }
 0x25f   :  { %v3489_v17 = vadd.f32 %v2182_v7, %v3355_v29  ;;  %v1315_v39 = vpop.f32.mrb[11].mxu0 }
 0x260   :  { %v3492_v18 = vadd.f32 %v3355_v29, %v1315_v39 }
 0x261   :  { %4596 = vst [vmem:[#allocation16_spill] sm:$0xff] %v3489_v17  ;;  %v3497_v37 = vsel %vm1456_vm1, %v3489_v17, -1e+30 }
 0x262   :  { %4597 = vst [vmem:[#allocation39_spill] sm:$0xff] %v3492_v18  ;;  %v3502_v10 = vsel %vm1456_vm1, %v3492_v18, -1e+30  ;;  %v1529_v25 = vsel %vm1495_vm2, %v3497_v37, -inf }
 0x263   :  { %1530 = vmax.xlane.f32.xlu0 %v1529_v25  ;;  %v1526_v53 = vsel %vm1495_vm2, %v3502_v10, -inf }
 0x264   :  { %1527 = vmax.xlane.f32.xlu1 %v1526_v53 }
 0x266   :  { %v2185_v1 = vpop.f32.mrb[12].mxu0 }
 0x267   :  { %v3509_v8 = vadd.f32 %v2185_v1, %v3355_v29  ;;  %v1325_v41 = vpop.f32.mrb[13].mxu0 }
 0x268   :  { %v3512_v6 = vadd.f32 %v3355_v29, %v1325_v41 }
 0x269   :  { %4598 = vst [vmem:[#allocation26_spill] sm:$0xff] %v3509_v8  ;;  %v3517_v49 = vsel %vm1456_vm1, %v3509_v8, -1e+30 }
 0x26a   :  { %4599 = vst [vmem:[#allocation4_spill] sm:$0xff] %v3512_v6  ;;  %v3522_v19 = vsel %vm1456_vm1, %v3512_v6, -1e+30  ;;  %v1535_v16 = vsel %vm1495_vm2, %v3517_v49, -inf }
 0x26b   :  { %1536 = vmax.xlane.f32.xlu0 %v1535_v16  ;;  %v1532_v30 = vsel %vm1495_vm2, %v3522_v19, -inf }
 0x26c   :  { %1533 = vmax.xlane.f32.xlu1 %v1532_v30 }
 0x27f   :  { %v3528_v27 = vpop.f32.mrb[10].mxu1 }
 0x280   :  { %v3530_v46 = vpop.f32.mrb[11].mxu1 }
 0x28a   :  { %v2188_v26 = vpop.f32.mrb[14].mxu0 }
 0x28b   :  { %v3533_v42 = vadd.f32 %v2188_v26, %v3355_v29  ;;  %v1335_v47 = vpop.f32.mrb[15].mxu0 }
 0x28c   :  { %v3536_v52 = vadd.f32 %v3355_v29, %v1335_v47  ;;  %v3585_v47 = vadd.f32 %v3394_v22, %v3355_v29 }
 0x28d   :  { %4600 = vst [vmem:[#allocation28_spill] sm:$0xff] %v3533_v42  ;;  %v3541_v32 = vsel %vm1456_vm1, %v3533_v42, -1e+30 }
 0x28e   :  { %4601 = vst [vmem:[#allocation6_spill] sm:$0xff] %v3536_v52  ;;  %v3546_v40 = vsel %vm1456_vm1, %v3536_v52, -1e+30  ;;  %v1541_v55 = vsel %vm1495_vm2, %v3541_v32, -inf  ;;  %4607 = vst [vmem:[#allocation41_spill] sm:$0xff] %v3585_v47 }
 0x28f   :  { %1542 = vmax.xlane.f32.xlu0 %v1541_v55  ;;  %v1538_v9 = vsel %vm1495_vm2, %v3546_v40, -inf  ;;  %v3589_v55 = vadd.f32 %v3355_v29, %v3401_v4 }
 0x290   :  { %1539 = vmax.xlane.f32.xlu1 %v1538_v9 }
 0x291   :  { %4608 = vst [vmem:[#allocation37_spill] sm:$0xff] %v3589_v55 }
 0x29c   :  { %v3552_v13 = vpop.f32.mrb[12].mxu1 }
 0x29d   :  { %v3554_v24 = vpop.f32.mrb[13].mxu1 }
 0x2a7   :  { %v2191_v63 = vpop.f32.mrb[16].mxu0 }
 0x2a8   :  { %v3557_v45 = vadd.f32 %v2191_v63, %v3355_v29  ;;  %v1345_v11 = vpop.f32.mrb[17].mxu0 }
 0x2a9   :  { %v3560_v5 = vadd.f32 %v3355_v29, %v1345_v11 }
 0x2aa   :  { %4602 = vst [vmem:[#allocation29_spill] sm:$0xff] %v3557_v45  ;;  %v3565_v7 = vsel %vm1456_vm1, %v3557_v45, -1e+30 }
 0x2ab   :  { %4603 = vst [vmem:[#allocation40_spill] sm:$0xff] %v3560_v5  ;;  %4604 = vst [vmem:[#allocation7_spill] sm:$0xff] %v3565_v7  ;;  %v3570_v39 = vsel %vm1456_vm1, %v3560_v5, -1e+30  ;;  %v1547_v25 = vsel %vm1495_vm2, %v3565_v7, -inf }
 0x2ac   :  { %4605 = vst [vmem:[#allocation9_spill] sm:$0xff] %v3570_v39  ;;  %1548 = vmax.xlane.f32.xlu0 %v1547_v25  ;;  %v1544_v53 = vsel %vm1495_vm2, %v3570_v39, -inf }
 0x2ad   :  { %1545 = vmax.xlane.f32.xlu1 %v1544_v53 }
 0x2b9   :  { %v3576_v1 = vpop.f32.mrb[14].mxu1 }
 0x2ba   :  { %v3578_v41 = vpop.f32.mrb[15].mxu1 }
 0x2cb   :  { %v2194_v16 = vpop.f32.mrb[18].mxu0 }
 0x2cc   :  { %v3581_v30 = vadd.f32 %v2194_v16, %v3355_v29  ;;  %v1355_v26 = vpop.f32.mrb[19].mxu0  ;;  %v3615_v16 = vsel %vm1456_vm1, %v3585_v47, -1e+30 }
 0x2cd   :  { %v3592_v9 = vadd.f32 %v3355_v29, %v1355_v26  ;;  %v3620_v26 = vsel %vm1456_vm1, %v3589_v55, -1e+30  ;;  %v1559_v5 = vsel %vm1495_vm2, %v3615_v16, -inf }
 0x2ce   :  { %4606 = vst [vmem:[#allocation27_spill] sm:$0xff] %v3581_v30  ;;  %v3597_v63 = vsel %vm1456_vm1, %v3581_v30, -1e+30  ;;  %v3628_v30 = vadd.f32 %v3355_v29, %v3430_v28  ;;  %v1556_v45 = vsel %vm1495_vm2, %v3620_v26, -inf  ;;  %v3646_v28 = vadd.f32 %v3447_v34, %v3355_v29 }
 0x2cf   :  { %4609 = vst [vmem:[#allocation18_spill] sm:$0xff] %v3592_v9  ;;  %4610 = vst [vmem:[#allocation38_spill] sm:$0xff] %v3597_v63  ;;  %v3602_v11 = vsel %vm1456_vm1, %v3592_v9, -1e+30  ;;  %v3604_v25 = vpop.f32.mrb[16].mxu1  ;;  %v1553_v22 = vsel %vm1495_vm2, %v3597_v63, -inf  ;;  %v3624_v9 = vadd.f32 %v3423_v43, %v3355_v29 }
 0x2d0   :  { %4611 = vst [vmem:[#allocation17_spill] sm:$0xff] %v3602_v11  ;;  %v3608_v4 = vpop.f32.mrb[17].mxu1  ;;  %v1550_v53 = vsel %vm1495_vm2, %v3602_v11, -inf  ;;  %4613 = vst [vmem:[#allocation11_spill] sm:$0xff] %v3628_v30  ;;  %1554 = vmax.xlane.f32.xlu0 %v1553_v22  ;;  %v3642_v43 = vsel %vm1456_vm1, %v3628_v30, -1e+30  ;;  %v3650_v22 = vadd.f32 %v3355_v29, %v3454_v3  ;;  %v3668_v3 = vadd.f32 %v3460_v44, %v3355_v29 }
 0x2d1   :  { %4612 = vst [vmem:[#allocation31_spill] sm:$0xff] %v3624_v9  ;;  %1551 = vmax.xlane.f32.xlu1 %v1550_v53  ;;  %v3637_v52 = vsel %vm1456_vm1, %v3624_v9, -1e+30  ;;  %4614 = vst [vmem:[#allocation43_spill] sm:$0xff] %v3646_v28  ;;  %v1562_v42 = vsel %vm1495_vm2, %v3642_v43, -inf }
 0x2d2   :  { %4615 = vst [vmem:[#allocation30_spill] sm:$0xff] %v3650_v22  ;;  %v1565_v53 = vsel %vm1495_vm2, %v3637_v52, -inf  ;;  %v3659_v6 = vsel %vm1456_vm1, %v3646_v28, -1e+30  ;;  %v3664_v34 = vsel %vm1456_vm1, %v3650_v22, -1e+30 }
 0x2d3   :  { %4616 = vst [vmem:[#allocation8_spill] sm:$0xff] %v3668_v3  ;;  %v1571_v8 = vsel %vm1495_vm2, %v3659_v6, -inf  ;;  %v1568_v18 = vsel %vm1495_vm2, %v3664_v34, -inf  ;;  %v3681_v17 = vsel %vm1456_vm1, %v3668_v3, -1e+30 }
 0x2d4   :  { %1560 = vmax.xlane.f32.xlu0 %v1559_v5  ;;  %v1501_v5 = vpop.xlane.xlu1 %1500  ;;  %v1577_v3 = vsel %vm1495_vm2, %v3681_v17, -inf }
 0x2d5   :  { %1557 = vmax.xlane.f32.xlu1 %v1556_v45  ;;  %v3672_v45 = vadd.f32 %v3355_v29, %v3465_v61  ;;  %v3690_v61 = vadd.f32 %v3484_v35, %v3355_v29  ;;  %v1611_v50 = vsub.f32 %v3372_v23, %v1501_v5  ;;  %v3714_v23 = vadd.f32 %v3528_v27, %v3355_v29 }
 0x2d7   :  { %4617 = vst [vmem:[#allocation20_spill] sm:$0xff] %v3672_v45  ;;  %v3686_v44 = vsel %vm1456_vm1, %v3672_v45, -1e+30  ;;  %4618 = vst [vmem:[#allocation19_spill] sm:$0xff] %v3690_v61  ;;  %v3705_v35 = vsel %vm1456_vm1, %v3690_v61, -1e+30 }
 0x2d8   :  { %1566 = vmax.xlane.f32.xlu0 %v1565_v53  ;;  %v1498_v53 = vpop.xlane.xlu0 %1497  ;;  %v1574_v45 = vsel %vm1495_vm2, %v3686_v44, -inf  ;;  %4620 = vst [vmem:[#allocation32_spill] sm:$0xff] %v3714_v23  ;;  %v1583_v5 = vsel %vm1495_vm2, %v3705_v35, -inf }
 0x2d9   :  { %1563 = vmax.xlane.f32.xlu1 %v1562_v42  ;;  %v3694_v42 = vadd.f32 %v3355_v29, %v3486_v21  ;;  %v1610_v62 = vsub.f32 %v3379_v36, %v1498_v53  ;;  %v3718_v36 = vadd.f32 %v3355_v29, %v3530_v46 }
 0x2db   :  { %4619 = vst [vmem:[#allocation42_spill] sm:$0xff] %v3694_v42  ;;  %v3710_v21 = vsel %vm1456_vm1, %v3694_v42, -1e+30  ;;  %4621 = vst [vmem:[#allocation10_spill] sm:$0xff] %v3718_v36  ;;  %v3727_v42 = vsel %vm1456_vm1, %v3714_v23, -1e+30 }
 0x2dc   :  { %1572 = vmax.xlane.f32.xlu0 %v1571_v8  ;;  %v1648_v8 = vmul.f32 1.442695, %v1610_v62  ;;  %v1580_v53 = vsel %vm1495_vm2, %v3710_v21, -inf  ;;  %v3732_v27 = vsel %vm1456_vm1, %v3718_v36, -1e+30  ;;  %v3740_v62 = vadd.f32 %v3355_v29, %v3554_v24 }
 0x2dd   :  { %1569 = vmax.xlane.f32.xlu1 %v1568_v18  ;;  %v1650_v18 = vmul.f32 1.442695, %v1611_v50  ;;  %v3736_v50 = vadd.f32 %v3552_v13, %v3355_v29  ;;  %v1589_v46 = vsel %vm1495_vm2, %v3727_v42, -inf  ;;  %v3758_v24 = vadd.f32 %v3576_v1, %v3355_v29 }
 0x2de   :  { %4623 = vst [vmem:[#allocation21_spill] sm:$0xff] %v3740_v62  ;;  %v3754_v13 = vsel %vm1456_vm1, %v3740_v62, -1e+30 }
 0x2df   :  { %4622 = vst [vmem:[#allocation22_spill] sm:$0xff] %v3736_v50  ;;  %2273 = vpow2.f32 %v1650_v18  ;;  %4624 = vst [vmem:[#allocation44_spill] sm:$0xff] %v3758_v24  ;;  %v3762_v18 = vadd.f32 %v3355_v29, %v3578_v41  ;;  %v3780_v41 = vadd.f32 %v3604_v25, %v3355_v29 }
 0x2e0   :  { %1578 = vmax.xlane.f32.xlu0 %v1577_v3  ;;  %2275 = vpow2.f32 %v1648_v8  ;;  %v1586_v3 = vsel %vm1495_vm2, %v3732_v27, -inf }
 0x2e1   :  { %1575 = vmax.xlane.f32.xlu1 %v1574_v45  ;;  %v3749_v45 = vsel %vm1456_vm1, %v3736_v50, -1e+30  ;;  %4625 = vst [vmem:[#allocation24_spill] sm:$0xff] %v3762_v18  ;;  %v3776_v1 = vsel %vm1456_vm1, %v3762_v18, -1e+30  ;;  %4626 = vst [vmem:[#allocation33_spill] sm:$0xff] %v3780_v41 }
 0x2e2   :  { %v1595_v8 = vsel %vm1495_vm2, %v3749_v45, -inf  ;;  %v3793_v18 = vsel %vm1456_vm1, %v3780_v41, -1e+30 }
 0x2e3   :  { %4628 = vst [vmem:[#allocation45_spill] sm:$0xff] %v3793_v18 }
 0x2e4   :  { %1584 = vmax.xlane.f32.xlu0 %v1583_v5  ;;  %v1592_v5 = vsel %vm1495_vm2, %v3754_v13, -inf }
 0x2e5   :  { %1581 = vmax.xlane.f32.xlu1 %v1580_v53  ;;  %v3771_v53 = vsel %vm1456_vm1, %v3758_v24, -1e+30  ;;  %v1598_v24 = vsel %vm1495_vm2, %v3776_v1, -inf }
 0x2e8   :  { %1590 = vmax.xlane.f32.xlu0 %v1589_v46  ;;  %v3784_v46 = vadd.f32 %v3355_v29, %v3608_v4  ;;  %v1607_v4 = vsel %vm1495_vm2, %v3793_v18, -inf }
 0x2e9   :  { %1587 = vmax.xlane.f32.xlu1 %v1586_v3  ;;  %v1601_v3 = vsel %vm1495_vm2, %v3771_v53, -inf  ;;  %v2274_v62 = vpop.eup %2273 }
 0x2ea   :  { %4627 = vst [vmem:[#allocation13_spill] sm:$0xff] %v3784_v46  ;;  %v3798_v25 = vsel %vm1456_vm1, %v3784_v46, -1e+30  ;;  %v2276_v29 = vpop.eup %2275  ;;  %v1504_v46 = vpop.xlane.xlu0 %1503 }
 0x2eb   :  { %4629 = vst [vmem:[#allocation34_spill] sm:$0xff] %v3798_v25  ;;  %v3810_v41 = vsel %vm1456_vm1, %v2276_v29, 0.0  ;;  %v1612_v48 = vsub.f32 %v3399_v59, %v1504_v46 }
 0x2ec   :  { %1596 = vmax.xlane.f32.xlu0 %v1595_v8  ;;  %v1604_v8 = vsel %vm1495_vm2, %v3798_v25, -inf }
 0x2ed   :  { %1593 = vmax.xlane.f32.xlu1 %v1592_v5  ;;  %v3806_v5 = vsel %vm1456_vm1, %v2274_v62, 0.0  ;;  %v1652_v11 = vmul.f32 1.442695, %v1612_v48 }
 0x2ee   :  { %v1507_v50 = vpop.xlane.xlu0 %1506 }
 0x2ef   :  { %v1613_v60 = vsub.f32 %v3408_v38, %v1507_v50 }
 0x2f0   :  { %1602 = vmax.xlane.f32.xlu0 %v1601_v3  ;;  %v1762_v3 = vsel %vm1495_vm2, %v3810_v41, 0.0 }
 0x2f1   :  { %1599 = vmax.xlane.f32.xlu1 %v1598_v24  ;;  %v1765_v24 = vsel %vm1495_vm2, %v3806_v5, 0.0  ;;  %v1654_v33 = vmul.f32 1.442695, %v1613_v60 }
 0x2f3   :  { %2277 = vpow2.f32 %v1654_v33 }
 0x2f4   :  { %1608 = vmax.xlane.f32.xlu0 %v1607_v4  ;;  %v1510_v4 = vpop.xlane.xlu1 %1509 }
 0x2f5   :  { %1605 = vmax.xlane.f32.xlu1 %v1604_v8  ;;  %v1513_v8 = vpop.xlane.xlu0 %1512  ;;  %v1614_v60 = vsub.f32 %v3428_v20, %v1510_v4 }
 0x2f6   :  { %v1615_v38 = vsub.f32 %v3421_v54, %v1513_v8 }
 0x2f8   :  { %1766 = vadd.xlane.f32.xlu0 %v1765_v24  ;;  %v3816_v23 = vpop.xlane.xlu1 %1515 }
 0x2f9   :  { %1763 = vadd.xlane.f32.xlu1 %v1762_v3  ;;  %v1519_v36 = vpop.xlane.xlu0 %1518 }
 0x2fc   :  { %v3820_v61 = vpop.xlane.xlu1 %1521 }
 0x2fd   :  { %v3818_v62 = vpop.xlane.xlu0 %1524 }
 0x300   :  { %v3824_v57 = vpop.xlane.xlu1 %1527 }
 0x301   :  { %v3822_v29 = vpop.xlane.xlu0 %1530 }
 0x304   :  { %v3828_v22 = vpop.xlane.xlu1 %1533 }
 0x305   :  { %v3826_v58 = vpop.xlane.xlu0 %1536 }
 0x31c   :  { %v3830_v24 = vpop.xlane.xlu0 %1542 }
 0x31d   :  { %v3832_v3 = vpop.xlane.xlu1 %1539 }
 0x339   :  { %v3834_v28 = vpop.xlane.xlu0 %1548 }
 0x33a   :  { %v3836_v31 = vpop.xlane.xlu1 %1545 }
 0x33b   :  { %4630 = vst [vmem:[#allocation12_spill] sm:$0xff] %v3836_v31 }
 0x35d   :  { %v3839_v30 = vpop.xlane.xlu0 %1554 }
 0x35e   :  { %v3841_v9 = vpop.xlane.xlu1 %1551 }
 0x361   :  { %v1561_v55 = vpop.xlane.xlu0 %1560 }
 0x362   :  { %v1558_v47 = vpop.xlane.xlu1 %1557  ;;  %v1631_v25 = vsub.f32 %v3615_v16, %v1561_v55 }
 0x363   :  { %v1630_v18 = vsub.f32 %v3620_v26, %v1558_v47  ;;  %v1658_v26 = vmul.f32 1.442695, %v1615_v38 }
 0x364   :  { %v1690_v63 = vmul.f32 1.442695, %v1631_v25 }
 0x365   :  { %v1688_v39 = vmul.f32 1.442695, %v1630_v18  ;;  %v1567_v31 = vpop.xlane.xlu0 %1566  ;;  %v1656_v18 = vmul.f32 1.442695, %v1614_v60 }
 0x366   :  { %v1564_v7 = vpop.xlane.xlu1 %1563  ;;  %2279 = vpow2.f32 %v1690_v63  ;;  %v1633_v50 = vsub.f32 %v3637_v52, %v1567_v31  ;;  %v1617_v52 = vsub.f32 %v3445_v14, %v1519_v36 }
 0x367   :  { %v1632_v59 = vsub.f32 %v3642_v43, %v1564_v7  ;;  %2281 = vpow2.f32 %v1688_v39  ;;  %v2278_v39 = vpop.eup %2277 }
 0x368   :  { %2283 = vpow2.f32 %v1652_v11  ;;  %v1694_v55 = vmul.f32 1.442695, %v1633_v50  ;;  %v1616_v11 = vsub.f32 %v3452_v2, %v3816_v23  ;;  %v1662_v8 = vmul.f32 1.442695, %v1617_v52 }
 0x369   :  { %v1692_v16 = vmul.f32 1.442695, %v1632_v59  ;;  %v1573_v47 = vpop.xlane.xlu0 %1572  ;;  %v3868_v23 = vsel %vm1456_vm1, %v2278_v39, 0.0 }
 0x36a   :  { %v1570_v48 = vpop.xlane.xlu1 %1569  ;;  %2285 = vpow2.f32 %v1694_v55  ;;  %v1635_v33 = vsub.f32 %v3659_v6, %v1573_v47  ;;  %v1660_v50 = vmul.f32 1.442695, %v1616_v11 }
 0x36b   :  { %2287 = vpow2.f32 %v1692_v16  ;;  %v1634_v54 = vsub.f32 %v3664_v34, %v1570_v48  ;;  %v1619_v48 = vsub.f32 %v3473_v51, %v3818_v62 }
 0x36c   :  { %2289 = vpow2.f32 %v1658_v26  ;;  %v1698_v7 = vmul.f32 1.442695, %v1635_v33 }
 0x36d   :  { %v1579_v63 = vpop.xlane.xlu0 %1578  ;;  %2291 = vpow2.f32 %v1656_v18  ;;  %v1696_v43 = vmul.f32 1.442695, %v1634_v54  ;;  %v1618_v54 = vsub.f32 %v3478_v15, %v3820_v61  ;;  %v1666_v39 = vmul.f32 1.442695, %v1619_v48 }
 0x36e   :  { %v1576_v31 = vpop.xlane.xlu1 %1575  ;;  %2293 = vpow2.f32 %v1698_v7  ;;  %v1637_v14 = vsub.f32 %v3681_v17, %v1579_v63  ;;  %v1621_v61 = vsub.f32 %v3497_v37, %v3822_v29 }
 0x36f   :  { %2295 = vpow2.f32 %v1696_v43  ;;  %v1636_v59 = vsub.f32 %v3686_v44, %v1576_v31  ;;  %v1771_v44 = vsel %vm1495_vm2, %v3868_v23, 0.0 }
 0x370   :  { %v2280_v20 = vpop.eup %2279  ;;  %2297 = vpow2.f32 %v1662_v8  ;;  %v1702_v26 = vmul.f32 1.442695, %v1637_v14 }
 0x371   :  { %v2282_v46 = vpop.eup %2281  ;;  %v1585_v25 = vpop.xlane.xlu0 %1584  ;;  %v3857_v4 = vsel %vm1456_vm1, %v2280_v20, 0.0  ;;  %2299 = vpow2.f32 %v1660_v50  ;;  %v1700_v63 = vmul.f32 1.442695, %v1636_v59 }
 0x372   :  { %v1582_v6 = vpop.xlane.xlu1 %1581  ;;  %v2284_v34 = vpop.eup %2283  ;;  %v1825_v36 = vsel %vm1495_vm2, %v3857_v4, 0.0  ;;  %v3864_v2 = vsel %vm1456_vm1, %v2282_v46, 0.0  ;;  %2301 = vpow2.f32 %v1702_v26  ;;  %v1639_v20 = vsub.f32 %v3705_v35, %v1585_v25 }
 0x373   :  { %1826 = vadd.xlane.f32.xlu0 %v1825_v36  ;;  %v1822_v17 = vsel %vm1495_vm2, %v3864_v2, 0.0  ;;  %v3879_v16 = vsel %vm1456_vm1, %v2284_v34, 0.0  ;;  %v1664_v46 = vmul.f32 1.442695, %v1618_v54  ;;  %2303 = vpow2.f32 %v1700_v63 }
 0x374   :  { %v2286_v38 = vpop.eup %2285  ;;  %1823 = vadd.xlane.f32.xlu1 %v1822_v17  ;;  %v1768_v31 = vsel %vm1495_vm2, %v3879_v16, 0.0  ;;  %v1638_v34 = vsub.f32 %v3710_v21, %v1582_v6  ;;  %2305 = vpow2.f32 %v1666_v39  ;;  %v1706_v14 = vmul.f32 1.442695, %v1639_v20 }
 0x375   :  { %v3873_v60 = vpop.xlane.xlu0 %1590  ;;  %v2288_v47 = vpop.eup %2287  ;;  %v3887_v33 = vsel %vm1456_vm1, %v2286_v38, 0.0  ;;  %v1670_v38 = vmul.f32 1.442695, %v1621_v61  ;;  %v1620_v21 = vsub.f32 %v3502_v10, %v3824_v57  ;;  %2307 = vpow2.f32 %v1664_v46 }
 0x376   :  { %v3875_v55 = vpop.xlane.xlu1 %1587  ;;  %v2290_v18 = vpop.eup %2289  ;;  %v3899_v52 = vsel %vm1456_vm1, %v2288_v47, 0.0  ;;  %v1831_v15 = vsel %vm1495_vm2, %v3887_v33, 0.0  ;;  %v1704_v59 = vmul.f32 1.442695, %v1638_v34  ;;  %2309 = vpow2.f32 %v1706_v14 }
 0x377   :  { %1772 = vadd.xlane.f32.xlu0 %v1771_v44  ;;  %v2292_v7 = vpop.eup %2291  ;;  %v3908_v11 = vsel %vm1456_vm1, %v2290_v18, 0.0  ;;  %v1828_v8 = vsel %vm1495_vm2, %v3899_v52, 0.0  ;;  %v1641_v10 = vsub.f32 %v3727_v42, %v3873_v60  ;;  %2311 = vpow2.f32 %v1670_v38 }
 0x378   :  { %1769 = vadd.xlane.f32.xlu1 %v1768_v31  ;;  %v2294_v43 = vpop.eup %2293  ;;  %v3919_v37 = vsel %vm1456_vm1, %v2292_v7, 0.0  ;;  %v1777_v36 = vsel %vm1495_vm2, %v3908_v11, 0.0  ;;  %v1668_v18 = vmul.f32 1.442695, %v1620_v21  ;;  %2313 = vpow2.f32 %v1704_v59 }
 0x379   :  { %v3893_v51 = vpop.xlane.xlu0 %1596  ;;  %v2296_v29 = vpop.eup %2295  ;;  %v3927_v6 = vsel %vm1456_vm1, %v2294_v43, 0.0  ;;  %v1774_v17 = vsel %vm1495_vm2, %v3919_v37, 0.0  ;;  %v1640_v31 = vsub.f32 %v3732_v27, %v3875_v55  ;;  %v1623_v20 = vsub.f32 %v3517_v49, %v3826_v58 }
 0x37a   :  { %v3895_v62 = vpop.xlane.xlu1 %1593  ;;  %v2298_v50 = vpop.eup %2297  ;;  %v3937_v26 = vsel %vm1456_vm1, %v2296_v29, 0.0  ;;  %v1837_v44 = vsel %vm1495_vm2, %v3927_v6, 0.0  ;;  %2315 = vpow2.f32 %v1668_v18  ;;  %v1622_v46 = vsub.f32 %v3522_v19, %v3828_v22 }
 0x37b   :  { %1832 = vadd.xlane.f32.xlu0 %v1831_v15  ;;  %v2300_v57 = vpop.eup %2299  ;;  %v3945_v54 = vsel %vm1456_vm1, %v2298_v50, 0.0  ;;  %v1834_v7 = vsel %vm1495_vm2, %v3937_v26, 0.0  ;;  %v1710_v15 = vmul.f32 1.442695, %v1641_v10  ;;  %v1708_v34 = vmul.f32 1.442695, %v1640_v31 }
 0x37c   :  { %1829 = vadd.xlane.f32.xlu1 %v1828_v8  ;;  %v2302_v63 = vpop.eup %2301  ;;  %v3953_v60 = vsel %vm1456_vm1, %v2300_v57, 0.0  ;;  %v1783_v43 = vsel %vm1495_vm2, %v3945_v54, 0.0  ;;  %v1674_v29 = vmul.f32 1.442695, %v1623_v20  ;;  %v1643_v14 = vsub.f32 %v3749_v45, %v3893_v51 }
 0x37d   :  { %v3913_v35 = vpop.xlane.xlu0 %1602  ;;  %v2304_v39 = vpop.eup %2303  ;;  %v3961_v27 = vsel %vm1456_vm1, %v2302_v63, 0.0  ;;  %v1780_v58 = vsel %vm1495_vm2, %v3953_v60, 0.0  ;;  %v1672_v38 = vmul.f32 1.442695, %v1622_v46  ;;  %v1642_v21 = vsub.f32 %v3754_v13, %v3895_v62 }
 0x37e   :  { %v3915_v25 = vpop.xlane.xlu1 %1599  ;;  %v2306_v55 = vpop.eup %2305  ;;  %v3969_v49 = vsel %vm1456_vm1, %v2304_v39, 0.0  ;;  %v1843_v19 = vsel %vm1495_vm2, %v3961_v27, 0.0  ;;  %v1714_v57 = vmul.f32 1.442695, %v1643_v14  ;;  %v1624_v13 = vsub.f32 %v3546_v40, %v3832_v3  ;;  %v4633_v14 = vld [vmem:[#allocation9_spill] sm:$0xff] }
 0x37f   :  { %1778 = vadd.xlane.f32.xlu0 %v1777_v36  ;;  %v2308_v8 = vpop.eup %2307  ;;  %v3977_v22 = vsel %vm1456_vm1, %v2306_v55, 0.0  ;;  %v1840_v50 = vsel %vm1495_vm2, %v3969_v49, 0.0  ;;  %v1645_v31 = vsub.f32 %v3771_v53, %v3913_v35  ;;  %v1954_v39 = vsel %vm1952_vm3, %v3363_v0, 0.0 }
 0x380   :  { %1775 = vadd.xlane.f32.xlu1 %v1774_v17  ;;  %v2310_v36 = vpop.eup %2309  ;;  %v3985_v45 = vsel %vm1456_vm1, %v2308_v8, 0.0  ;;  %v1625_v17 = vsub.f32 %v3541_v32, %v3830_v24  ;;  %v1789_v10 = vsel %vm1495_vm2, %v3977_v22, 0.0  ;;  %v1676_v20 = vmul.f32 1.442695, %v1624_v13 }
 0x381   :  { %v3931_v47 = vpop.xlane.xlu0 %1608  ;;  %v2312_v59 = vpop.eup %2311  ;;  %v3995_v62 = vsel %vm1456_vm1, %v2310_v36, 0.0  ;;  %v1786_v18 = vsel %vm1495_vm2, %v3985_v45, 0.0  ;;  %v1953_v35 = vsel %vm1952_vm3, %v3366_v56, 0.0 }
 0x382   :  { %v3933_v48 = vpop.xlane.xlu1 %1605  ;;  %v2314_v51 = vpop.eup %2313  ;;  %v4006_v40 = vsel %vm1456_vm1, %v2312_v59, 0.0  ;;  %v1678_v63 = vmul.f32 1.442695, %v1625_v17  ;;  %v4634_v59 = vld [vmem:[#allocation38_spill] sm:$0xff] }
 0x383   :  { %1838 = vadd.xlane.f32.xlu0 %v1837_v44  ;;  %v1712_v44 = vmul.f32 1.442695, %v1642_v21  ;;  %v4002_v24 = vsel %vm1456_vm1, %v2314_v51, 0.0  ;;  %v1795_v0 = vsel %vm1495_vm2, %v4006_v40, 0.0  ;;  %v1629_v51 = vsub.f32 %v4634_v59, %v3839_v30 }
 0x384   :  { %1835 = vadd.xlane.f32.xlu1 %v1834_v7  ;;  %v2316_v32 = vpop.eup %2315  ;;  %v1849_v7 = vsel %vm1495_vm2, %v3995_v62, 0.0  ;;  %v1846_v53 = vsel %vm1495_vm2, %v4002_v24, 0.0 }
 0x385   :  { %v1767_v42 = vpop.xlane.xlu0 %1766 }
 0x386   :  { %v1764_v61 = vpop.xlane.xlu1 %1763  ;;  %2317 = vrcp.f32 %v1767_v42 }
 0x387   :  { %1784 = vadd.xlane.f32.xlu0 %v1783_v43  ;;  %2319 = vrcp.f32 %v1764_v61  ;;  %v1644_v43 = vsub.f32 %v3776_v1, %v3915_v25  ;;  %v4631_v1 = vld [vmem:[#allocation7_spill] sm:$0xff]  ;;  %v1718_v25 = vmul.f32 1.442695, %v1645_v31  ;;  %v4636_v31 = vld [vmem:[#allocation45_spill] sm:$0xff] }
 0x388   :  { %1781 = vadd.xlane.f32.xlu1 %v1780_v58  ;;  %2321 = vpow2.f32 %v1710_v15 }
 0x389   :  { %2323 = vpow2.f32 %v1708_v34  ;;  %v1716_v36 = vmul.f32 1.442695, %v1644_v43 }
 0x38a   :  { %2325 = vpow2.f32 %v1674_v29  ;;  %v4632_v29 = vld [vmem:[#allocation12_spill] sm:$0xff] }
 0x38b   :  { %1844 = vadd.xlane.f32.xlu0 %v1843_v19  ;;  %2327 = vpow2.f32 %v1672_v38  ;;  %v1626_v19 = vsub.f32 %v4633_v14, %v4632_v29 }
 0x38c   :  { %1841 = vadd.xlane.f32.xlu1 %v1840_v50  ;;  %2329 = vpow2.f32 %v1714_v57 }
 0x38d   :  { %2331 = vpow2.f32 %v1712_v44  ;;  %v1680_v13 = vmul.f32 1.442695, %v1626_v19  ;;  %v4635_v44 = vld [vmem:[#allocation17_spill] sm:$0xff] }
 0x38e   :  { %2333 = vpow2.f32 %v1678_v63  ;;  %v1686_v63 = vmul.f32 1.442695, %v1629_v51 }
 0x38f   :  { %1790 = vadd.xlane.f32.xlu0 %v1789_v10  ;;  %2335 = vpow2.f32 %v1676_v20 }
 0x390   :  { %1787 = vadd.xlane.f32.xlu1 %v1786_v18  ;;  %v2318_v3 = vpop.eup %2317  ;;  %2337 = vpow2.f32 %v1718_v25  ;;  %v1628_v18 = vsub.f32 %v4635_v44, %v3841_v9 }
 0x391   :  { %v2320_v42 = vpop.eup %2319  ;;  %v1879_v15 = vmul.f32 %v2318_v3, %v3806_v5  ;;  %v4028_v5 = vsel %vm1456_vm1, %v2316_v32, 0.0  ;;  %2339 = vpow2.f32 %v1716_v36 }
 0x392   :  { %v2322_v61 = vpop.eup %2321  ;;  %v1877_v55 = vmul.f32 %v2320_v42, %v3810_v41  ;;  %v1627_v41 = vsub.f32 %v4631_v1, %v3834_v28  ;;  %v1792_v28 = vsel %vm1495_vm2, %v4028_v5, 0.0  ;;  %v1684_v20 = vmul.f32 1.442695, %v1628_v18 }
 0x393   :  { %1850 = vadd.xlane.f32.xlu0 %v1849_v7  ;;  %v1992_v46 = vadd.f32 %v1954_v39, %v1879_v15  ;;  %v2324_v34 = vpop.eup %2323  ;;  %v4038_v56 = vsel %vm1456_vm1, %v2322_v61, 0.0  ;;  %v1647_v7 = vsub.f32 %v4636_v31, %v3931_v47  ;;  %v4637_v15 = vld [vmem:[#allocation34_spill] sm:$0xff] }
 0x394   :  { %1847 = vadd.xlane.f32.xlu1 %v1846_v53  ;;  %v1991_v58 = vadd.f32 %v1953_v35, %v1877_v55  ;;  %v2326_v8 = vpop.eup %2325  ;;  %v4050_v38 = vsel %vm1456_vm1, %v2324_v34, 0.0  ;;  %v1682_v50 = vmul.f32 1.442695, %v1627_v41  ;;  %v1855_v17 = vsel %vm1495_vm2, %v4038_v56, 0.0 }
 0x395   :  { %2030 = vst.msk [vmem:[%s4441_s5 + $0x8] sm:$0xff] %vm1495_vm2, %v1992_v46  ;;  %v2328_v21 = vpop.eup %2327  ;;  %v4058_v57 = vsel %vm1456_vm1, %v2326_v8, 0.0  ;;  %v1852_v32 = vsel %vm1495_vm2, %v4050_v38, 0.0  ;;  %v1646_v61 = vsub.f32 %v4637_v15, %v3933_v48  ;;  %v1722_v53 = vmul.f32 1.442695, %v1647_v7 }
 0x396   :  { %2029 = vst.msk [vmem:[%s4441_s5] sm:$0xff] %vm1495_vm2, %v1991_v58  ;;  %v2330_v10 = vpop.eup %2329  ;;  %v4066_v30 = vsel %vm1456_vm1, %v2328_v21, 0.0  ;;  %2341 = vpow2.f32 %v1682_v50  ;;  %v1801_v42 = vsel %vm1495_vm2, %v4058_v57, 0.0 }
 0x397   :  { %1796 = vadd.xlane.f32.xlu0 %v1795_v0  ;;  %v2332_v3 = vpop.eup %2331  ;;  %v4074_v9 = vsel %vm1456_vm1, %v2330_v10, 0.0  ;;  %2343 = vpow2.f32 %v1680_v13  ;;  %v1798_v43 = vsel %vm1495_vm2, %v4066_v30, 0.0  ;;  %v1720_v0 = vmul.f32 1.442695, %v1646_v61 }
 0x398   :  { %1793 = vadd.xlane.f32.xlu1 %v1792_v28  ;;  %v2334_v39 = vpop.eup %2333  ;;  %v4082_v47 = vsel %vm1456_vm1, %v2332_v3, 0.0  ;;  %2345 = vpow2.f32 %v1686_v63  ;;  %v1861_v35 = vsel %vm1495_vm2, %v4074_v9, 0.0 }
 0x399   :  { %v2336_v55 = vpop.eup %2335  ;;  %v4088_v46 = vsel %vm1456_vm1, %v2334_v39, 0.0  ;;  %2347 = vpow2.f32 %v1684_v20  ;;  %v1858_v34 = vsel %vm1495_vm2, %v4082_v47, 0.0 }
 0x39a   :  { %v2338_v48 = vpop.eup %2337  ;;  %v4094_v1 = vsel %vm1456_vm1, %v2336_v55, 0.0  ;;  %2349 = vpow2.f32 %v1722_v53  ;;  %v1807_v25 = vsel %vm1495_vm2, %v4088_v46, 0.0 }
 0x39b   :  { %1856 = vadd.xlane.f32.xlu0 %v1855_v17  ;;  %v2340_v41 = vpop.eup %2339  ;;  %v4100_v58 = vsel %vm1456_vm1, %v2338_v48, 0.0  ;;  %2351 = vpow2.f32 %v1720_v0  ;;  %v1804_v29 = vsel %vm1495_vm2, %v4094_v1, 0.0 }
 0x39c   :  { %1853 = vadd.xlane.f32.xlu1 %v1852_v32  ;;  %v4106_v14 = vsel %vm1456_vm1, %v2340_v41, 0.0  ;;  %v1867_v36 = vsel %vm1495_vm2, %v4100_v58, 0.0  ;;  %v4638_v41 = vld [vmem:[#allocation41_spill] sm:$0xff] }
 0x39d   :  { %v1864_v50 = vsel %vm1495_vm2, %v4106_v14, 0.0 }
 0x39f   :  { %1802 = vadd.xlane.f32.xlu0 %v1801_v42 }
 0x3a0   :  { %1799 = vadd.xlane.f32.xlu1 %v1798_v43  ;;  %v2342_v8 = vpop.eup %2341 }
 0x3a1   :  { %v2344_v19 = vpop.eup %2343  ;;  %v4112_v28 = vsel %vm1456_vm1, %v2342_v8, 0.0 }
 0x3a2   :  { %v2346_v21 = vpop.eup %2345  ;;  %v4118_v59 = vsel %vm1456_vm1, %v2344_v19, 0.0  ;;  %v1813_v17 = vsel %vm1495_vm2, %v4112_v28, 0.0 }
 0x3a3   :  { %1862 = vadd.xlane.f32.xlu0 %v1861_v35  ;;  %v2348_v51 = vpop.eup %2347  ;;  %v4124_v10 = vsel %vm1456_vm1, %v2346_v21, 0.0  ;;  %v1810_v44 = vsel %vm1495_vm2, %v4118_v59, 0.0  ;;  %v4639_v21 = vld [vmem:[#allocation37_spill] sm:$0xff] }
 0x3a4   :  { %1859 = vadd.xlane.f32.xlu1 %v1858_v34  ;;  %v2350_v13 = vpop.eup %2349  ;;  %v4130_v18 = vsel %vm1456_vm1, %v2348_v51, 0.0  ;;  %v1819_v3 = vsel %vm1495_vm2, %v4124_v10, 0.0 }
 0x3a5   :  { %v2352_v32 = vpop.eup %2351  ;;  %v4136_v63 = vsel %vm1456_vm1, %v2350_v13, 0.0  ;;  %v1816_v31 = vsel %vm1495_vm2, %v4130_v18, 0.0 }
 0x3a6   :  { %v4142_v7 = vsel %vm1456_vm1, %v2352_v32, 0.0  ;;  %v1873_v42 = vsel %vm1495_vm2, %v4136_v63, 0.0 }
 0x3a7   :  { %1808 = vadd.xlane.f32.xlu0 %v1807_v25  ;;  %v1870_v39 = vsel %vm1495_vm2, %v4142_v7, 0.0  ;;  %v1974_v25 = vsel %vm1952_vm3, %v4638_v41, 0.0 }
 0x3a8   :  { %1805 = vadd.xlane.f32.xlu1 %v1804_v29 }
 0x3ab   :  { %1868 = vadd.xlane.f32.xlu0 %v1867_v36 }
 0x3ac   :  { %1865 = vadd.xlane.f32.xlu1 %v1864_v50  ;;  %v1973_v50 = vsel %vm1952_vm3, %v4639_v21, 0.0 }
 0x3af   :  { %1814 = vadd.xlane.f32.xlu0 %v1813_v17 }
 0x3b0   :  { %1811 = vadd.xlane.f32.xlu1 %v1810_v44  ;;  %v4640_v44 = vld [vmem:[#allocation14_spill] sm:$0xff] }
 0x3b3   :  { %1820 = vadd.xlane.f32.xlu0 %v1819_v3 }
 0x3b4   :  { %1817 = vadd.xlane.f32.xlu1 %v1816_v31 }
 0x3b7   :  { %1874 = vadd.xlane.f32.xlu0 %v1873_v42 }
 0x3b8   :  { %1871 = vadd.xlane.f32.xlu1 %v1870_v39  ;;  %v4641_v39 = vld [vmem:[#allocation2_spill] sm:$0xff] }
 0x400   :  { %v1827_v20 = vpop.xlane.xlu0 %1826 }
 0x401   :  { %2353 = vrcp.f32 %v1827_v20  ;;  %v1824_v15 = vpop.xlane.xlu1 %1823 }
 0x402   :  { %2355 = vrcp.f32 %v1824_v15 }
 0x404   :  { %v1773_v61 = vpop.xlane.xlu0 %1772 }
 0x405   :  { %2357 = vrcp.f32 %v1773_v61  ;;  %v1770_v43 = vpop.xlane.xlu1 %1769 }
 0x406   :  { %2359 = vrcp.f32 %v1770_v43 }
 0x408   :  { %v1833_v55 = vpop.xlane.xlu0 %1832 }
 0x409   :  { %2361 = vrcp.f32 %v1833_v55  ;;  %v1830_v53 = vpop.xlane.xlu1 %1829  ;;  %v4642_v55 = vld [vmem:[#allocation31_spill] sm:$0xff] }
 0x40a   :  { %2363 = vrcp.f32 %v1830_v53 }
 0x40b   :  { %v2354_v35 = vpop.eup %2353 }
 0x40c   :  { %v1919_v48 = vmul.f32 %v2354_v35, %v3857_v4  ;;  %v1779_v0 = vpop.xlane.xlu0 %1778  ;;  %v2356_v34 = vpop.eup %2355 }
 0x40d   :  { %2365 = vrcp.f32 %v1779_v0  ;;  %v1917_v29 = vmul.f32 %v2356_v34, %v3864_v2  ;;  %v1776_v19 = vpop.xlane.xlu1 %1775  ;;  %v1956_v2 = vsel %vm1952_vm3, %v4640_v44, 0.0  ;;  %v4643_v34 = vld [vmem:[#allocation11_spill] sm:$0xff] }
 0x40e   :  { %v2012_v8 = vadd.f32 %v1974_v25, %v1919_v48  ;;  %2367 = vrcp.f32 %v1776_v19  ;;  %v4644_v19 = vld [vmem:[#allocation3_spill] sm:$0xff] }
 0x40f   :  { %v2358_v36 = vpop.eup %2357  ;;  %v2011_v4 = vadd.f32 %v1973_v50, %v1917_v29 }
 0x410   :  { %2050 = vst.msk [vmem:[%s4441_s5 + $0xa8] sm:$0xff] %vm1495_vm2, %v2012_v8  ;;  %v1883_v51 = vmul.f32 %v2358_v36, %v3868_v23  ;;  %v1839_v17 = vpop.xlane.xlu0 %1838  ;;  %v2360_v13 = vpop.eup %2359  ;;  %v1955_v23 = vsel %vm1952_vm3, %v4641_v39, 0.0 }
 0x411   :  { %2369 = vrcp.f32 %v1839_v17  ;;  %2049 = vst.msk [vmem:[%s4441_s5 + $0xa0] sm:$0xff] %vm1495_vm2, %v2011_v4  ;;  %v1881_v3 = vmul.f32 %v2360_v13, %v3879_v16  ;;  %v1836_v31 = vpop.xlane.xlu1 %1835  ;;  %v1976_v16 = vsel %vm1952_vm3, %v4642_v55, 0.0  ;;  %v4648_v55 = vld [vmem:[#allocation5_spill] sm:$0xff] }
 0x412   :  { %v1994_v32 = vadd.f32 %v1956_v2, %v1883_v51  ;;  %2371 = vrcp.f32 %v1836_v31  ;;  %v4645_v51 = vld [vmem:[#allocation36_spill] sm:$0xff] }
 0x413   :  { %v2362_v42 = vpop.eup %2361  ;;  %v1993_v20 = vadd.f32 %v1955_v23, %v1881_v3  ;;  %v4647_v23 = vld [vmem:[#allocation30_spill] sm:$0xff] }
 0x414   :  { %2032 = vst.msk [vmem:[%s4441_s5 + $0x18] sm:$0xff] %vm1495_vm2, %v1994_v32  ;;  %v1923_v15 = vmul.f32 %v2362_v42, %v3887_v33  ;;  %v1785_v61 = vpop.xlane.xlu0 %1784  ;;  %v2364_v43 = vpop.eup %2363  ;;  %v1975_v33 = vsel %vm1952_vm3, %v4643_v34, 0.0  ;;  %v4646_v32 = vld [vmem:[#allocation43_spill] sm:$0xff] }
 0x415   :  { %2373 = vrcp.f32 %v1785_v61  ;;  %2031 = vst.msk [vmem:[%s4441_s5 + $0x10] sm:$0xff] %vm1495_vm2, %v1993_v20  ;;  %v1921_v35 = vmul.f32 %v2364_v43, %v3899_v52  ;;  %v1782_v48 = vpop.xlane.xlu1 %1781  ;;  %v1958_v52 = vsel %vm1952_vm3, %v4644_v19, 0.0 }
 0x416   :  { %v2014_v53 = vadd.f32 %v1976_v16, %v1923_v15  ;;  %2375 = vrcp.f32 %v1782_v48 }
 0x417   :  { %v2366_v0 = vpop.eup %2365  ;;  %v2013_v41 = vadd.f32 %v1975_v33, %v1921_v35 }
 0x418   :  { %2052 = vst.msk [vmem:[%s4441_s5 + $0xb8] sm:$0xff] %vm1495_vm2, %v2014_v53  ;;  %v1887_v25 = vmul.f32 %v2366_v0, %v3908_v11  ;;  %v1845_v8 = vpop.xlane.xlu0 %1844  ;;  %v2368_v29 = vpop.eup %2367  ;;  %v1957_v11 = vsel %vm1952_vm3, %v4645_v51, 0.0  ;;  %v4649_v0 = vld [vmem:[#allocation25_spill] sm:$0xff] }
 0x419   :  { %2377 = vrcp.f32 %v1845_v8  ;;  %2051 = vst.msk [vmem:[%s4441_s5 + $0xb0] sm:$0xff] %vm1495_vm2, %v2013_v41  ;;  %v1885_v21 = vmul.f32 %v2368_v29, %v3919_v37  ;;  %v1842_v50 = vpop.xlane.xlu1 %1841  ;;  %v1978_v37 = vsel %vm1952_vm3, %v4646_v32, 0.0  ;;  %v4650_v8 = vld [vmem:[#allocation8_spill] sm:$0xff] }
 0x41a   :  { %v1996_v36 = vadd.f32 %v1958_v52, %v1887_v25  ;;  %2379 = vrcp.f32 %v1842_v50 }
 0x41b   :  { %v2370_v4 = vpop.eup %2369  ;;  %v1995_v17 = vadd.f32 %v1957_v11, %v1885_v21  ;;  %v4651_v21 = vld [vmem:[#allocation20_spill] sm:$0xff] }
 0x41c   :  { %2034 = vst.msk [vmem:[%s4441_s5 + $0x28] sm:$0xff] %vm1495_vm2, %v1996_v36  ;;  %v1927_v13 = vmul.f32 %v2370_v4, %v3927_v6  ;;  %v1791_v44 = vpop.xlane.xlu0 %1790  ;;  %v2372_v2 = vpop.eup %2371  ;;  %v1977_v6 = vsel %vm1952_vm3, %v4647_v23, 0.0  ;;  %v4654_v23 = vld [vmem:[#allocation19_spill] sm:$0xff] }
 0x41d   :  { %2381 = vrcp.f32 %v1791_v44  ;;  %2033 = vst.msk [vmem:[%s4441_s5 + $0x20] sm:$0xff] %vm1495_vm2, %v1995_v17  ;;  %v1925_v31 = vmul.f32 %v2372_v2, %v3937_v26  ;;  %v1788_v42 = vpop.xlane.xlu1 %1787  ;;  %v1960_v26 = vsel %vm1952_vm3, %v4648_v55, 0.0  ;;  %v4652_v17 = vld [vmem:[#allocation15_spill] sm:$0xff] }
 0x41e   :  { %v2016_v3 = vadd.f32 %v1978_v37, %v1927_v13  ;;  %2383 = vrcp.f32 %v1788_v42  ;;  %v4653_v37 = vld [vmem:[#allocation35_spill] sm:$0xff] }
 0x41f   :  { %v2374_v39 = vpop.eup %2373  ;;  %v2015_v20 = vadd.f32 %v1977_v6, %v1925_v31 }
 0x420   :  { %2054 = vst.msk [vmem:[%s4441_s5 + $0xc8] sm:$0xff] %vm1495_vm2, %v2016_v3  ;;  %v1891_v15 = vmul.f32 %v2374_v39, %v3945_v54  ;;  %v1851_v61 = vpop.xlane.xlu0 %1850  ;;  %v2376_v43 = vpop.eup %2375  ;;  %v1959_v54 = vsel %vm1952_vm3, %v4649_v0, 0.0 }
 0x421   :  { %2385 = vrcp.f32 %v1851_v61  ;;  %2053 = vst.msk [vmem:[%s4441_s5 + $0xc0] sm:$0xff] %vm1495_vm2, %v2015_v20  ;;  %v1889_v53 = vmul.f32 %v2376_v43, %v3953_v60  ;;  %v1848_v35 = vpop.xlane.xlu1 %1847  ;;  %v1980_v60 = vsel %vm1952_vm3, %v4650_v8, 0.0  ;;  %v4655_v43 = vld [vmem:[#allocation42_spill] sm:$0xff] }
 0x422   :  { %v1998_v16 = vadd.f32 %v1960_v26, %v1891_v15  ;;  %2387 = vrcp.f32 %v1848_v35  ;;  %v4656_v35 = vld [vmem:[#allocation16_spill] sm:$0xff] }
 0x423   :  { %v2378_v48 = vpop.eup %2377  ;;  %v1997_v34 = vadd.f32 %v1959_v54, %v1889_v53 }
 0x424   :  { %2036 = vst.msk [vmem:[%s4441_s5 + $0x38] sm:$0xff] %vm1495_vm2, %v1998_v16  ;;  %v1931_v33 = vmul.f32 %v2378_v48, %v3961_v27  ;;  %v1797_v41 = vpop.xlane.xlu0 %1796  ;;  %v2380_v25 = vpop.eup %2379  ;;  %v1979_v27 = vsel %vm1952_vm3, %v4651_v21, 0.0 }
 0x425   :  { %2389 = vrcp.f32 %v1797_v41  ;;  %2035 = vst.msk [vmem:[%s4441_s5 + $0x30] sm:$0xff] %vm1495_vm2, %v1997_v34  ;;  %v1929_v19 = vmul.f32 %v2380_v25, %v3969_v49  ;;  %v1794_v52 = vpop.xlane.xlu1 %1793  ;;  %v1962_v49 = vsel %vm1952_vm3, %v4652_v17, 0.0  ;;  %v4660_v17 = vld [vmem:[#allocation26_spill] sm:$0xff] }
 0x426   :  { %v2018_v29 = vadd.f32 %v1980_v60, %v1931_v33  ;;  %2391 = vrcp.f32 %v1794_v52  ;;  %v4657_v33 = vld [vmem:[#allocation39_spill] sm:$0xff] }
 0x427   :  { %v2382_v36 = vpop.eup %2381  ;;  %v2017_v50 = vadd.f32 %v1979_v27, %v1929_v19  ;;  %v4659_v27 = vld [vmem:[#allocation10_spill] sm:$0xff] }
 0x428   :  { %2056 = vst.msk [vmem:[%s4441_s5 + $0xd8] sm:$0xff] %vm1495_vm2, %v2018_v29  ;;  %v1895_v4 = vmul.f32 %v2382_v36, %v3977_v22  ;;  %v1857_v51 = vpop.xlane.xlu0 %1856  ;;  %v2384_v11 = vpop.eup %2383  ;;  %v1961_v22 = vsel %vm1952_vm3, %v4653_v37, 0.0  ;;  %v4658_v29 = vld [vmem:[#allocation32_spill] sm:$0xff] }
 0x429   :  { %2393 = vrcp.f32 %v1857_v51  ;;  %2055 = vst.msk [vmem:[%s4441_s5 + $0xd0] sm:$0xff] %vm1495_vm2, %v2017_v50  ;;  %v1893_v44 = vmul.f32 %v2384_v11, %v3985_v45  ;;  %v1854_v2 = vpop.xlane.xlu1 %1853  ;;  %v1982_v45 = vsel %vm1952_vm3, %v4654_v23, 0.0 }
 0x42a   :  { %v2000_v13 = vadd.f32 %v1962_v49, %v1895_v4  ;;  %2395 = vrcp.f32 %v1854_v2 }
 0x42b   :  { %v2386_v32 = vpop.eup %2385  ;;  %v1999_v3 = vadd.f32 %v1961_v22, %v1893_v44 }
 0x42c   :  { %2038 = vst.msk [vmem:[%s4441_s5 + $0x48] sm:$0xff] %vm1495_vm2, %v2000_v13  ;;  %v1935_v31 = vmul.f32 %v2386_v32, %v3995_v62  ;;  %v1803_v42 = vpop.xlane.xlu0 %1802  ;;  %v2388_v39 = vpop.eup %2387  ;;  %v1981_v62 = vsel %vm1952_vm3, %v4655_v43, 0.0  ;;  %v4661_v32 = vld [vmem:[#allocation4_spill] sm:$0xff] }
 0x42d   :  { %2397 = vrcp.f32 %v1803_v42  ;;  %2037 = vst.msk [vmem:[%s4441_s5 + $0x40] sm:$0xff] %vm1495_vm2, %v1999_v3  ;;  %v1933_v20 = vmul.f32 %v2388_v39, %v4002_v24  ;;  %v1800_v15 = vpop.xlane.xlu1 %1799  ;;  %v1964_v24 = vsel %vm1952_vm3, %v4656_v35, 0.0  ;;  %v4662_v42 = vld [vmem:[#allocation22_spill] sm:$0xff] }
 0x42e   :  { %v2020_v6 = vadd.f32 %v1982_v45, %v1935_v31  ;;  %2399 = vrcp.f32 %v1800_v15 }
 0x42f   :  { %v2390_v61 = vpop.eup %2389  ;;  %v2019_v55 = vadd.f32 %v1981_v62, %v1933_v20  ;;  %v4663_v20 = vld [vmem:[#allocation21_spill] sm:$0xff] }
 0x430   :  { %2058 = vst.msk [vmem:[%s4441_s5 + $0xe8] sm:$0xff] %vm1495_vm2, %v2020_v6  ;;  %v1899_v26 = vmul.f32 %v2390_v61, %v4006_v40  ;;  %v1863_v16 = vpop.xlane.xlu0 %1862  ;;  %v2392_v53 = vpop.eup %2391  ;;  %v1963_v40 = vsel %vm1952_vm3, %v4657_v33, 0.0  ;;  %v4666_v33 = vld [vmem:[#allocation44_spill] sm:$0xff] }
 0x431   :  { %2401 = vrcp.f32 %v1863_v16  ;;  %2057 = vst.msk [vmem:[%s4441_s5 + $0xe0] sm:$0xff] %vm1495_vm2, %v2019_v55  ;;  %v1897_v0 = vmul.f32 %v2392_v53, %v4028_v5  ;;  %v1860_v54 = vpop.xlane.xlu1 %1859  ;;  %v1984_v5 = vsel %vm1952_vm3, %v4658_v29, 0.0  ;;  %v4664_v55 = vld [vmem:[#allocation28_spill] sm:$0xff] }
 0x432   :  { %v2002_v48 = vadd.f32 %v1964_v24, %v1899_v26  ;;  %2403 = vrcp.f32 %v1860_v54  ;;  %v4665_v24 = vld [vmem:[#allocation6_spill] sm:$0xff] }
 0x433   :  { %v2394_v34 = vpop.eup %2393  ;;  %v2001_v41 = vadd.f32 %v1963_v40, %v1897_v0 }
 0x434   :  { %2040 = vst.msk [vmem:[%s4441_s5 + $0x58] sm:$0xff] %vm1495_vm2, %v2002_v48  ;;  %v1939_v25 = vmul.f32 %v2394_v34, %v4038_v56  ;;  %v1809_v8 = vpop.xlane.xlu0 %1808  ;;  %v2396_v60 = vpop.eup %2395  ;;  %v1983_v56 = vsel %vm1952_vm3, %v4659_v27, 0.0 }
 0x435   :  { %2405 = vrcp.f32 %v1809_v8  ;;  %2039 = vst.msk [vmem:[%s4441_s5 + $0x50] sm:$0xff] %vm1495_vm2, %v2001_v41  ;;  %v1937_v52 = vmul.f32 %v2396_v60, %v4050_v38  ;;  %v1806_v36 = vpop.xlane.xlu1 %1805  ;;  %v1966_v38 = vsel %vm1952_vm3, %v4660_v17, 0.0  ;;  %v4667_v60 = vld [vmem:[#allocation24_spill] sm:$0xff] }
 0x436   :  { %v2022_v19 = vadd.f32 %v1984_v5, %v1939_v25  ;;  %2407 = vrcp.f32 %v1806_v36 }
 0x437   :  { %v2398_v21 = vpop.eup %2397  ;;  %v2021_v50 = vadd.f32 %v1983_v56, %v1937_v52  ;;  %v4668_v52 = vld [vmem:[#allocation29_spill] sm:$0xff]  ;;  %v4669_v56 = vld [vmem:[#allocation40_spill] sm:$0xff] }
 0x438   :  { %2060 = vst.msk [vmem:[%s4441_s5 + $0xf8] sm:$0xff] %vm1495_vm2, %v2022_v19  ;;  %v1903_v4 = vmul.f32 %v2398_v21, %v4058_v57  ;;  %v1869_v51 = vpop.xlane.xlu0 %1868  ;;  %v2400_v11 = vpop.eup %2399  ;;  %v1965_v57 = vsel %vm1952_vm3, %v4661_v32, 0.0 }
 0x439   :  { %2409 = vrcp.f32 %v1869_v51  ;;  %2059 = vst.msk [vmem:[%s4441_s5 + $0xf0] sm:$0xff] %vm1495_vm2, %v2021_v50  ;;  %v1901_v13 = vmul.f32 %v2400_v11, %v4066_v30  ;;  %v1866_v44 = vpop.xlane.xlu1 %1865  ;;  %v1986_v30 = vsel %vm1952_vm3, %v4662_v42, 0.0  ;;  %v1969_v50 = vsel %vm1952_vm3, %v4669_v56, 0.0  ;;  %v4670_v11 = vld [vmem:[#allocation27_spill] sm:$0xff] }
 0x43a   :  { %v2004_v49 = vadd.f32 %v1966_v38, %v1903_v4  ;;  %2411 = vrcp.f32 %v1866_v44  ;;  %v1972_v17 = vsel %vm1952_vm3, %v4670_v11, 0.0 }
 0x43b   :  { %v2402_v2 = vpop.eup %2401  ;;  %v2003_v37 = vadd.f32 %v1965_v57, %v1901_v13  ;;  %v4671_v13 = vld [vmem:[#allocation18_spill] sm:$0xff]  ;;  %v4672_v57 = vld [vmem:[#allocation33_spill] sm:$0xff] }
 0x43c   :  { %2042 = vst.msk [vmem:[%s4441_s5 + $0x68] sm:$0xff] %vm1495_vm2, %v2004_v49  ;;  %v1943_v22 = vmul.f32 %v2402_v2, %v4074_v9  ;;  %v1815_v3 = vpop.xlane.xlu0 %1814  ;;  %v2404_v31 = vpop.eup %2403  ;;  %v1985_v9 = vsel %vm1952_vm3, %v4663_v20, 0.0  ;;  %v1971_v44 = vsel %vm1952_vm3, %v4671_v13, 0.0 }
 0x43d   :  { %2413 = vrcp.f32 %v1815_v3  ;;  %2041 = vst.msk [vmem:[%s4441_s5 + $0x60] sm:$0xff] %vm1495_vm2, %v2003_v37  ;;  %v1941_v23 = vmul.f32 %v2404_v31, %v4082_v47  ;;  %v1812_v45 = vpop.xlane.xlu1 %1811  ;;  %v1968_v47 = vsel %vm1952_vm3, %v4664_v55, 0.0  ;;  %v1990_v37 = vsel %vm1952_vm3, %v4672_v57, 0.0  ;;  %v4673_v3 = vld [vmem:[#allocation13_spill] sm:$0xff] }
 0x43e   :  { %v2024_v39 = vadd.f32 %v1986_v30, %v1943_v22  ;;  %2415 = vrcp.f32 %v1812_v45  ;;  %v1989_v31 = vsel %vm1952_vm3, %v4673_v3, 0.0 }
 0x43f   :  { %v2406_v6 = vpop.eup %2405  ;;  %v2023_v15 = vadd.f32 %v1985_v9, %v1941_v23 }
 0x440   :  { %2062 = vst.msk [vmem:[%s4441_s5 + $0x108] sm:$0xff] %vm1495_vm2, %v2024_v39  ;;  %v1907_v61 = vmul.f32 %v2406_v6, %v4088_v46  ;;  %v1821_v43 = vpop.xlane.xlu0 %1820  ;;  %v2408_v62 = vpop.eup %2407  ;;  %v1967_v46 = vsel %vm1952_vm3, %v4665_v24, 0.0 }
 0x441   :  { %2417 = vrcp.f32 %v1821_v43  ;;  %2061 = vst.msk [vmem:[%s4441_s5 + $0x100] sm:$0xff] %vm1495_vm2, %v2023_v15  ;;  %v1905_v16 = vmul.f32 %v2408_v62, %v4094_v1  ;;  %v1818_v53 = vpop.xlane.xlu1 %1817  ;;  %v1988_v1 = vsel %vm1952_vm3, %v4666_v33, 0.0 }
 0x442   :  { %v2006_v26 = vadd.f32 %v1968_v47, %v1907_v61  ;;  %2419 = vrcp.f32 %v1818_v53 }
 0x443   :  { %v2410_v35 = vpop.eup %2409  ;;  %v2005_v48 = vadd.f32 %v1967_v46, %v1905_v16 }
 0x444   :  { %2044 = vst.msk [vmem:[%s4441_s5 + $0x78] sm:$0xff] %vm1495_vm2, %v2006_v26  ;;  %v1947_v0 = vmul.f32 %v2410_v35, %v4100_v58  ;;  %v1875_v54 = vpop.xlane.xlu0 %1874  ;;  %v2412_v34 = vpop.eup %2411  ;;  %v1987_v58 = vsel %vm1952_vm3, %v4667_v60, 0.0 }
 0x445   :  { %2421 = vrcp.f32 %v1875_v54  ;;  %2043 = vst.msk [vmem:[%s4441_s5 + $0x70] sm:$0xff] %vm1495_vm2, %v2005_v48  ;;  %v1945_v41 = vmul.f32 %v2412_v34, %v4106_v14  ;;  %v1872_v25 = vpop.xlane.xlu1 %1871  ;;  %v1970_v14 = vsel %vm1952_vm3, %v4668_v52, 0.0 }
 0x446   :  { %v2026_v40 = vadd.f32 %v1988_v1, %v1947_v0  ;;  %2423 = vrcp.f32 %v1872_v25 }
 0x447   :  { %v2414_v8 = vpop.eup %2413  ;;  %v2025_v29 = vadd.f32 %v1987_v58, %v1945_v41 }
 0x448   :  { %2064 = vst.msk [vmem:[%s4441_s5 + $0x118] sm:$0xff] %vm1495_vm2, %v2026_v40  ;;  %v1911_v5 = vmul.f32 %v2414_v8, %v4112_v28  ;;  %v2416_v19 = vpop.eup %2415 }
 0x449   :  { %2063 = vst.msk [vmem:[%s4441_s5 + $0x110] sm:$0xff] %vm1495_vm2, %v2025_v29  ;;  %v1909_v21 = vmul.f32 %v2416_v19, %v4118_v59 }
 0x44a   :  { %v2008_v36 = vadd.f32 %v1970_v14, %v1911_v5 }
 0x44b   :  { %v2418_v27 = vpop.eup %2417  ;;  %v2007_v28 = vadd.f32 %v1969_v50, %v1909_v21 }
 0x44c   :  { %2046 = vst.msk [vmem:[%s4441_s5 + $0x88] sm:$0xff] %vm1495_vm2, %v2008_v36  ;;  %v1915_v4 = vmul.f32 %v2418_v27, %v4124_v10  ;;  %v2420_v51 = vpop.eup %2419 }
 0x44d   :  { %2045 = vst.msk [vmem:[%s4441_s5 + $0x80] sm:$0xff] %vm1495_vm2, %v2007_v28  ;;  %v1913_v38 = vmul.f32 %v2420_v51, %v4130_v18 }
 0x44e   :  { %v2010_v59 = vadd.f32 %v1972_v17, %v1915_v4 }
 0x44f   :  { %v2422_v49 = vpop.eup %2421  ;;  %v2009_v10 = vadd.f32 %v1971_v44, %v1913_v38 }
 0x450   :  { %2048 = vst.msk [vmem:[%s4441_s5 + $0x98] sm:$0xff] %vm1495_vm2, %v2010_v59  ;;  %v1951_v2 = vmul.f32 %v2422_v49, %v4136_v63  ;;  %v2424_v32 = vpop.eup %2423 }
 0x451   :  { %2047 = vst.msk [vmem:[%s4441_s5 + $0x90] sm:$0xff] %vm1495_vm2, %v2009_v10  ;;  %v1949_v22 = vmul.f32 %v2424_v32, %v4142_v7 }
 0x452   :  { %v2028_v18 = vadd.f32 %v1990_v37, %v1951_v2 }
 0x453   :  { %v2027_v63 = vadd.f32 %v1989_v31, %v1949_v22 }
 0x454   :  { %2066 = vst.msk [vmem:[%s4441_s5 + $0x128] sm:$0xff] %vm1495_vm2, %v2028_v18 }
 0x455   :  { %2065 = vst.msk [vmem:[%s4441_s5 + $0x120] sm:$0xff] %vm1495_vm2, %v2027_v63 }

</bundles_post_ra>
